<compile_context>
chip_gen: v6e
topology: v6e:2x2x1
jax: 0.10.0
libtpu: 0.0.40
codegen_flags: <defaults>
</compile_context>

<pallas_src>
import functools
import math

import jax
import jax.numpy as jnp
from jax import lax
from jax.experimental import pallas as pl
from jax.experimental.pallas import tpu as pltpu

# MXU input dtype (f32 accumulation everywhere).  Set to jnp.float32 for
# bit-faithful f32 matmuls.
MXU_DTYPE = jnp.bfloat16
# Scoped-VMEM limit: below v7x's 64 MiB physical, well above actual usage.
VMEM_LIMIT = 48 * 1024 * 1024


def _pick_tile(dim, target, align):
    """Largest tile <= target that is a multiple of `align` AND divides `dim`;
    falls back to the full dimension (always a legal block shape)."""
    if dim <= target:
        return dim
    t = (min(target, dim) // align) * align
    while t >= align:
        if dim % t == 0:
            return t
        t -= align
    return dim


# ----------------------------------------------------------------------------
# Kernels
# ----------------------------------------------------------------------------
def _matmul_bias_kernel(x_ref, w_ref, b_ref, o_ref, acc_ref):
    # Tiled y = x @ w + b with f32 accumulator; k axis is the reduction axis.
    @pl.when(pl.program_id(2) == 0)
    def _():
        acc_ref[...] = jnp.zeros_like(acc_ref)

    acc_ref[...] += jnp.dot(x_ref[...].astype(w_ref.dtype), w_ref[...],
                            preferred_element_type=jnp.float32)

    @pl.when(pl.program_id(2) == pl.num_programs(2) - 1)
    def _():
        o_ref[...] = (acc_ref[...] + b_ref[...]).astype(o_ref.dtype)


def _proj_add_ln_kernel(a_ref, w_ref, b_ref, r_ref, g_ref, bb_ref, o_ref, *, eps):
    # out = LayerNorm((a @ w + b) + residual) * gamma + beta    (norm over D)
    y = jnp.dot(a_ref[...].astype(w_ref.dtype), w_ref[...],
                preferred_element_type=jnp.float32) + b_ref[...]
    x = y + r_ref[...].astype(jnp.float32)
    mu = jnp.mean(x, axis=-1, keepdims=True)
    var = jnp.mean((x - mu) ** 2, axis=-1, keepdims=True)
    n = (x - mu) * lax.rsqrt(var + eps)
    o_ref[...] = (n * g_ref[...] + bb_ref[...]).astype(o_ref.dtype)


def _ffn_add_ln_kernel(x_ref, w1_ref, b1_ref, w2_ref, b2_ref, g_ref, bb_ref,
                       o_ref, *, eps):
    # out = LayerNorm(x + relu(x@w1+b1)@w2 + b2); h never leaves VMEM.
    x = x_ref[...].astype(jnp.float32)
    h = jnp.dot(x.astype(w1_ref.dtype), w1_ref[...],
                preferred_element_type=jnp.float32) + b1_ref[...]
    h = jnp.maximum(h, 0.0)
    y = jnp.dot(h.astype(w2_ref.dtype), w2_ref[...],
                preferred_element_type=jnp.float32) + b2_ref[...]
    z = y + x
    mu = jnp.mean(z, axis=-1, keepdims=True)
    var = jnp.mean((z - mu) ** 2, axis=-1, keepdims=True)
    n = (z - mu) * lax.rsqrt(var + eps)
    o_ref[...] = (n * g_ref[...] + bb_ref[...]).astype(o_ref.dtype)


def _mha_kernel(*args, num_heads, d_head, scale, has_mask, self_attn):
    # One batch element per grid step; heads are static column slices of the
    # fused projection output, output is written back head-concatenated
    # (lane-dense (Sq, D) store).  No transposes inside or outside the kernel.
    if self_attn:
        qkv_ref = args[0]
        nxt = 1
    else:
        q_ref, kv_ref = args[0], args[1]
        nxt = 2
    if has_mask:
        mask_ref = args[nxt]
        nxt += 1
    o_ref = args[nxt]

    D = num_heads * d_head
    mask = mask_ref[...].astype(jnp.float32) if has_mask else None

    outs = []
    for h in range(num_heads):
        lo = h * d_head
        if self_attn:
            q = qkv_ref[:, lo:lo + d_head]
            k = qkv_ref[:, D + lo:D + lo + d_head]
            v = qkv_ref[:, 2 * D + lo:2 * D + lo + d_head]
        else:
            q = q_ref[:, lo:lo + d_head]
            k = kv_ref[:, lo:lo + d_head]
            v = kv_ref[:, D + lo:D + lo + d_head]
        q = q.astype(MXU_DTYPE)
        k = k.astype(MXU_DTYPE)
        v = v.astype(MXU_DTYPE)
        # contract last dims of q and k directly (no .T / XLU transpose)
        s = lax.dot_general(q, k, (((1,), (1,)), ((), ())),
                            preferred_element_type=jnp.float32) * scale
        if mask is not None:
            s = s + mask                      # mask add stays in f32
        m = jnp.max(s, axis=-1, keepdims=True)
        p = jnp.exp(s - m)
        l = jnp.sum(p, axis=-1, keepdims=True)
        o = lax.dot_general(p.astype(MXU_DTYPE), v, (((1,), (0,)), ((), ())),
                            preferred_element_type=jnp.float32)
        outs.append(o * pl.reciprocal(l, approx=True))
    o_ref[...] = jnp.concatenate(outs, axis=-1).astype(o_ref.dtype)


# ----------------------------------------------------------------------------
# Pallas wrappers
# ----------------------------------------------------------------------------
def linear(x2d, w, b, *, tm_t=256, tn_t=512, tk_t=512):
    """Tiled y = x @ w + b (bf16 MXU inputs, f32 accumulation)."""
    M, K = x2d.shape
    N = w.shape[1]
    tm = _pick_tile(M, tm_t, 8)
    tn = _pick_tile(N, tn_t, 128)
    tk = _pick_tile(K, tk_t, 128)
    return pl.pallas_call(
        _matmul_bias_kernel,
        out_shape=jax.ShapeDtypeStruct((M, N), jnp.float32),
        grid=(M // tm, N // tn, K // tk),
        in_specs=[
            pl.BlockSpec((tm, tk), lambda i, j, k: (i, k)),
            pl.BlockSpec((tk, tn), lambda i, j, k: (k, j)),
            pl.BlockSpec((1, tn), lambda i, j, k: (0, j)),
        ],
        out_specs=pl.BlockSpec((tm, tn), lambda i, j, k: (i, j)),
        scratch_shapes=[pltpu.VMEM((tm, tn), jnp.float32)],
        compiler_params=pltpu.CompilerParams(
            dimension_semantics=("parallel", "parallel", "arbitrary"),
            vmem_limit_bytes=VMEM_LIMIT),
    )(x2d, w.astype(MXU_DTYPE), b.reshape(1, N).astype(jnp.float32))


def proj_add_ln(attn2d, wo, bo, residual2d, gamma, beta, eps=1e-5):
    """Fused: LayerNorm(attn @ wo + bo + residual)."""
    M, D = attn2d.shape
    tm = _pick_tile(M, 256, 8)
    return pl.pallas_call(
        functools.partial(_proj_add_ln_kernel, eps=eps),
        out_shape=jax.ShapeDtypeStruct((M, D), residual2d.dtype),
        grid=(M // tm,),
        in_specs=[
            pl.BlockSpec((tm, D), lambda i: (i, 0)),   # attention output
            pl.BlockSpec((D, D), lambda i: (0, 0)),    # wo (kept resident)
            pl.BlockSpec((1, D), lambda i: (0, 0)),    # bo
            pl.BlockSpec((tm, D), lambda i: (i, 0)),   # residual
            pl.BlockSpec((1, D), lambda i: (0, 0)),    # gamma
            pl.BlockSpec((1, D), lambda i: (0, 0)),    # beta
        ],
        out_specs=pl.BlockSpec((tm, D), lambda i: (i, 0)),
        compiler_params=pltpu.CompilerParams(
            dimension_semantics=("parallel",), vmem_limit_bytes=VMEM_LIMIT),
    )(attn2d, wo.astype(MXU_DTYPE), bo.reshape(1, D), residual2d,
      gamma.reshape(1, D), beta.reshape(1, D))


def ffn_add_ln(x2d, w1, b1, w2, b2, gamma, beta, eps=1e-5):
    """Fused FFN sublayer: LayerNorm(x + relu(x@w1+b1)@w2 + b2)."""
    M, D = x2d.shape
    F = w1.shape[1]
    tm = _pick_tile(M, 256, 8)
    return pl.pallas_call(
        functools.partial(_ffn_add_ln_kernel, eps=eps),
        out_shape=jax.ShapeDtypeStruct((M, D), x2d.dtype),
        grid=(M // tm,),
        in_specs=[
            pl.BlockSpec((tm, D), lambda i: (i, 0)),
            pl.BlockSpec((D, F), lambda i: (0, 0)),
            pl.BlockSpec((1, F), lambda i: (0, 0)),
            pl.BlockSpec((F, D), lambda i: (0, 0)),
            pl.BlockSpec((1, D), lambda i: (0, 0)),
            pl.BlockSpec((1, D), lambda i: (0, 0)),
            pl.BlockSpec((1, D), lambda i: (0, 0)),
        ],
        out_specs=pl.BlockSpec((tm, D), lambda i: (i, 0)),
        compiler_params=pltpu.CompilerParams(
            dimension_semantics=("parallel",), vmem_limit_bytes=VMEM_LIMIT),
    )(x2d, w1.astype(MXU_DTYPE), b1.reshape(1, F),
      w2.astype(MXU_DTYPE), b2.reshape(1, D),
      gamma.reshape(1, D), beta.reshape(1, D))


def attention(q_arr, kv_arr, mask, *, B, Sq, Sk, num_heads, d_model, self_attn):
    """Scaled dot-product attention over a (B,) grid; heads sliced via static
    column windows of the fused projection — no (B,H,S,dh) transposes.
    # TODO(synk): for very long Sk (>~2K) switch to a blocked online-softmax
    # (flash) formulation with a kv grid axis so the (Sq,Sk) scores never
    # materialize in full.
    """
    dh = d_model // num_heads
    scale = 1.0 / math.sqrt(dh)
    has_mask = mask is not None

    in_specs = []
    args = []
    if self_attn:
        in_specs.append(pl.BlockSpec((Sq, 3 * d_model), lambda b: (b, 0)))
        args.append(q_arr)                       # fused (B*Sq, 3D) qkv
    else:
        in_specs.append(pl.BlockSpec((Sq, d_model), lambda b: (b, 0)))
        in_specs.append(pl.BlockSpec((Sk, 2 * d_model), lambda b: (b, 0)))
        args.extend([q_arr, kv_arr])
    if has_mask:
        in_specs.append(pl.BlockSpec((Sq, Sk), lambda b: (0, 0)))
        args.append(mask.astype(jnp.float32))

    kernel = functools.partial(_mha_kernel, num_heads=num_heads, d_head=dh,
                               scale=scale, has_mask=has_mask,
                               self_attn=self_attn)
    return pl.pallas_call(
        kernel,
        out_shape=jax.ShapeDtypeStruct((B * Sq, d_model), jnp.float32),
        grid=(B,),
        in_specs=in_specs,
        out_specs=pl.BlockSpec((Sq, d_model), lambda b: (b, 0)),
        compiler_params=pltpu.CompilerParams(
            dimension_semantics=("parallel",), vmem_limit_bytes=VMEM_LIMIT),
    )(*args)


# ----------------------------------------------------------------------------
# Model pieces
# ----------------------------------------------------------------------------
def sinusoidal_pe(seq_len, d_model):
    pos = jnp.arange(seq_len, dtype=jnp.float32)[:, None]
    i = jnp.arange(0, d_model, 2, dtype=jnp.float32)
    div = jnp.exp(-math.log(10000.0) * i / d_model)
    pe = jnp.zeros((seq_len, d_model), jnp.float32)
    pe = pe.at[:, 0::2].set(jnp.sin(pos * div))
    pe = pe.at[:, 1::2].set(jnp.cos(pos * div))
    return pe


def decoder_layer(src2d, x2d, source_mask, target_mask, p, B, Sq, Sk, num_heads):
    D = x2d.shape[1]
    # masked self-attention sublayer (fused QKV projection)
    qkv = linear(x2d, p["self_w_qkv"], p["self_b_qkv"])
    sa = attention(qkv, None, target_mask, B=B, Sq=Sq, Sk=Sq,
                   num_heads=num_heads, d_model=D, self_attn=True)
    x2d = proj_add_ln(sa, p["self_wo"], p["self_bo"], x2d,
                      p["ln1_g"], p["ln1_b"])
    # cross-attention sublayer (queries = target, keys/values = source)
    q = linear(x2d, p["cross_wq"], p["cross_bq"])
    kv = linear(src2d, p["cross_w_kv"], p["cross_b_kv"])
    ca = attention(q, kv, source_mask, B=B, Sq=Sq, Sk=Sk,
                   num_heads=num_heads, d_model=D, self_attn=False)
    x2d = proj_add_ln(ca, p["cross_wo"], p["cross_bo"], x2d,
                      p["ln2_g"], p["ln2_b"])
    # feed-forward sublayer (fully fused, no HBM round-trip of the d_ff tensor)
    x2d = ffn_add_ln(x2d, p["w1"], p["b1"], p["w2"], p["b2"],
                     p["ln3_g"], p["ln3_b"])
    return x2d


def decoder_forward(params, source, target, source_mask=None, target_mask=None,
                    *, num_heads):
    B, Sq, D = target.shape
    Sk = source.shape[1]
    # positional encoding (dropout = identity at inference); plain JAX — XLA
    # fuses this elementwise add for free (no grid=(1,) launch overhead).
    x = target + params["pe"][:Sq][None, :, :]
    x2d = x.reshape(B * Sq, D)
    src2d = source.reshape(B * Sk, D)
    for lp in params["layers"]:
        x2d = decoder_layer(src2d, x2d, source_mask, target_mask, lp,
                            B, Sq, Sk, num_heads)
    return x2d.reshape(B, Sq, D)


# ----------------------------------------------------------------------------
# Deterministic parameter init (QKV / KV projections fused at init time)
# ----------------------------------------------------------------------------
def init_params(key, num_decoders, d_model, d_feedforward, seq_len):
    def mk(k, n):
        return jax.random.normal(k, (d_model, n), jnp.float32) * 0.02

    layers = []
    for _ in range(num_decoders):
        key, *ks = jax.random.split(key, 11)
        layers.append({
            # self-attention: wq|wk|wv fused into one (D, 3D) weight
            "self_w_qkv": jnp.concatenate([mk(ks[0], d_model), mk(ks[1], d_model),
                                           mk(ks[2], d_model)], axis=1),
            "self_b_qkv": jnp.zeros((3 * d_model,), jnp.float32),
            "self_wo": mk(ks[3], d_model),
            "self_bo": jnp.zeros((d_model,), jnp.float32),
            # cross-attention: separate q; wk|wv fused into (D, 2D)
            "cross_wq": mk(ks[4], d_model),
            "cross_bq": jnp.zeros((d_model,), jnp.float32),
            "cross_w_kv": jnp.concatenate([mk(ks[5], d_model),
                                           mk(ks[6], d_model)], axis=1),
            "cross_b_kv": jnp.zeros((2 * d_model,), jnp.float32),
            "cross_wo": mk(ks[7], d_model),
            "cross_bo": jnp.zeros((d_model,), jnp.float32),
            # feed-forward
            "w1": jax.random.normal(ks[8], (d_model, d_feedforward), jnp.float32) * 0.02,
            "b1": jnp.zeros((d_feedforward,), jnp.float32),
            "w2": jax.random.normal(ks[9], (d_feedforward, d_model), jnp.float32) * 0.02,
            "b2": jnp.zeros((d_model,), jnp.float32),
            # layer norms
            "ln1_g": jnp.ones((d_model,), jnp.float32),
            "ln1_b": jnp.zeros((d_model,), jnp.float32),
            "ln2_g": jnp.ones((d_model,), jnp.float32),
            "ln2_b": jnp.zeros((d_model,), jnp.float32),
            "ln3_g": jnp.ones((d_model,), jnp.float32),
            "ln3_b": jnp.zeros((d_model,), jnp.float32),
        })
    return {"pe": sinusoidal_pe(seq_len, d_model), "layers": layers}


# ----------------------------------------------------------------------------
if __name__ == "__main__":
    # Small shapes consistent with the module's forward
    B, S, D = 2, 8, 32
    num_heads = 4
    d_ff = 64
    num_decoders = 2

    key = jax.random.PRNGKey(0)
    k_src, k_tgt, k_par = jax.random.split(key, 3)
    source = jax.random.normal(k_src, (B, S, D), jnp.float32)
    target = jax.random.normal(k_tgt, (B, S, D), jnp.float32)

    # causal (look-ahead) additive mask for the target self-attention
    causal = jnp.tril(jnp.ones((S, S), jnp.bool_))
    target_mask = jnp.where(causal, 0.0, -1e9).astype(jnp.float32)
    source_mask = None  # no padding mask -> mask path compiled out entirely

    params = init_params(k_par, num_decoders, D, d_ff, seq_len=S)

    fwd = jax.jit(functools.partial(decoder_forward, num_heads=num_heads))
    out = fwd(params, source, target, source_mask, target_mask)
    out = jax.block_until_ready(out)
    assert out.shape == (B, S, D), out.shape
    print("KERNEL_OK")
</pallas_src>

<mosaic_0001>
module attributes {stable_mosaic.version = 11 : i64} {
  func.func @_matmul_bias_kernel(%arg0: i32, %arg1: i32, %arg2: i32, %arg3: memref<16x32xf32, #tpu.memory_space<vmem>>, %arg4: memref<32x96xbf16, #tpu.memory_space<vmem>>, %arg5: memref<1x96xf32, #tpu.memory_space<vmem>>, %arg6: memref<16x96xf32, #tpu.memory_space<vmem>>, %arg7: memref<16x96xf32, #tpu.memory_space<vmem>>) attributes {dimension_semantics = [#tpu.dimension_semantics<parallel>, #tpu.dimension_semantics<parallel>, #tpu.dimension_semantics<arbitrary>], iteration_bounds = array<i64: 1, 1, 1>, scalar_prefetch = 0 : i64, scratch_operands = 1 : i64, tpu.core_type = #tpu.core_type<tc>, window_params = [{transform_indices = @transform_0, window_bounds = array<i64: 16, 32>}, {transform_indices = @transform_1, window_bounds = array<i64: 32, 96>}, {transform_indices = @transform_2, window_bounds = array<i64: 1, 96>}, {transform_indices = @transform_3, window_bounds = array<i64: 16, 96>}]} {
    %c0_i32 = arith.constant 0 : i32
    %0 = arith.cmpi eq, %arg2, %c0_i32 : i32
    %1 = arith.extui %0 : i1 to i32
    %c0_i32_0 = arith.constant 0 : i32
    %2 = arith.cmpi ne, %1, %c0_i32_0 : i32
    scf.if %2 {
      %cst_10 = arith.constant 0.000000e+00 : f32
      %13 = vector.broadcast %cst_10 : f32 to vector<16x96xf32>
      %c0_11 = arith.constant 0 : index
      %c0_12 = arith.constant 0 : index
      %14 = vector.load %arg7[%c0_11, %c0_12] : memref<16x96xf32, #tpu.memory_space<vmem>>, vector<16x96xf32>
      tpu.vector_store %arg7[%c0_11, %c0_12], %13 {strides = array<i32>} : memref<16x96xf32, #tpu.memory_space<vmem>>, vector<16x96xf32>,
    } else {
    }
    %c0 = arith.constant 0 : index
    %c0_1 = arith.constant 0 : index
    %3 = vector.load %arg7[%c0, %c0_1] : memref<16x96xf32, #tpu.memory_space<vmem>>, vector<16x96xf32>
    %c0_2 = arith.constant 0 : index
    %c0_3 = arith.constant 0 : index
    %4 = vector.load %arg3[%c0_2, %c0_3] : memref<16x32xf32, #tpu.memory_space<vmem>>, vector<16x32xf32>
    %5 = arith.truncf %4 : vector<16x32xf32> to vector<16x32xbf16>
    %c0_4 = arith.constant 0 : index
    %c0_5 = arith.constant 0 : index
    %6 = vector.load %arg4[%c0_4, %c0_5] : memref<32x96xbf16, #tpu.memory_space<vmem>>, vector<32x96xbf16>
    %cst = arith.constant dense<0.000000e+00> : vector<16x96xf32>
    %7 = tpu.matmul %5, %6, %cst {dimension_numbers = #tpu.dot_dimension_numbers<[1], [0], [0], [1], [0, 0, 1, 1], [], []>} : vector<16x32xbf16>, vector<32x96xbf16>, vector<16x96xf32> -> vector<16x96xf32>
    %8 = arith.addf %3, %7 : vector<16x96xf32>
    %c0_6 = arith.constant 0 : index
    %c0_7 = arith.constant 0 : index
    %9 = vector.load %arg7[%c0_6, %c0_7] : memref<16x96xf32, #tpu.memory_space<vmem>>, vector<16x96xf32>
    tpu.vector_store %arg7[%c0_6, %c0_7], %8 {strides = array<i32>} : memref<16x96xf32, #tpu.memory_space<vmem>>, vector<16x96xf32>,
    %c0_i32_8 = arith.constant 0 : i32
    %10 = arith.cmpi eq, %arg2, %c0_i32_8 : i32
    %11 = arith.extui %10 : i1 to i32
    %c0_i32_9 = arith.constant 0 : i32
    %12 = arith.cmpi ne, %11, %c0_i32_9 : i32
    scf.if %12 {
      %c0_10 = arith.constant 0 : index
      %c0_11 = arith.constant 0 : index
      %13 = vector.load %arg7[%c0_10, %c0_11] : memref<16x96xf32, #tpu.memory_space<vmem>>, vector<16x96xf32>
      %c0_12 = arith.constant 0 : index
      %c0_13 = arith.constant 0 : index
      %14 = vector.load %arg5[%c0_12, %c0_13] : memref<1x96xf32, #tpu.memory_space<vmem>>, vector<1x96xf32>
      %15 = vector.broadcast %14 : vector<1x96xf32> to vector<16x96xf32>
      %16 = arith.addf %13, %15 : vector<16x96xf32>
      %c0_14 = arith.constant 0 : index
      %c0_15 = arith.constant 0 : index
      %17 = vector.load %arg6[%c0_14, %c0_15] : memref<16x96xf32, #tpu.memory_space<vmem>>, vector<16x96xf32>
      tpu.vector_store %arg6[%c0_14, %c0_15], %16 {strides = array<i32>} : memref<16x96xf32, #tpu.memory_space<vmem>>, vector<16x96xf32>,
    } else {
    }
    return
  }
  func.func @transform_0(%arg0: i32, %arg1: i32, %arg2: i32) -> (i32, i32) {
    %c0_i32 = arith.constant 0 : i32
    return %arg0, %arg2 : i32, i32
  }
  func.func @transform_1(%arg0: i32, %arg1: i32, %arg2: i32) -> (i32, i32) {
    %c0_i32 = arith.constant 0 : i32
    return %arg2, %arg1 : i32, i32
  }
  func.func @transform_2(%arg0: i32, %arg1: i32, %arg2: i32) -> (i32, i32) {
    %c0_i32 = arith.constant 0 : i32
    %c0_i32_0 = arith.constant 0 : i32
    return %c0_i32, %arg1 : i32, i32
  }
  func.func @transform_3(%arg0: i32, %arg1: i32, %arg2: i32) -> (i32, i32) {
    %c0_i32 = arith.constant 0 : i32
    return %arg0, %arg1 : i32, i32
  }
}

module attributes {stable_mosaic.version = 11 : i64} {
  func.func @_mha_kernel(%arg0: i32, %arg1: memref<8x96xf32, #tpu.memory_space<vmem>>, %arg2: memref<8x8xf32, #tpu.memory_space<vmem>>, %arg3: memref<8x32xf32, #tpu.memory_space<vmem>>) attributes {dimension_semantics = [#tpu.dimension_semantics<parallel>], iteration_bounds = array<i64: 2>, scalar_prefetch = 0 : i64, scratch_operands = 0 : i64, tpu.core_type = #tpu.core_type<tc>, window_params = [{transform_indices = @transform_0, window_bounds = array<i64: 8, 96>}, {pipeline_mode = #tpu.pipeline_mode<synchronous>, transform_indices = @transform_1, window_bounds = array<i64: 8, 8>}, {transform_indices = @transform_2, window_bounds = array<i64: 8, 32>}]} {
    %c0 = arith.constant 0 : index
    %c0_0 = arith.constant 0 : index
    %0 = vector.load %arg2[%c0, %c0_0] : memref<8x8xf32, #tpu.memory_space<vmem>>, vector<8x8xf32>
    %c0_1 = arith.constant 0 : index
    %c0_2 = arith.constant 0 : index
    %1 = vector.load %arg1[%c0_1, %c0_2] : memref<8x96xf32, #tpu.memory_space<vmem>>, vector<8x8xf32>
    %c0_3 = arith.constant 0 : index
    %c32 = arith.constant 32 : index
    %2 = vector.load %arg1[%c0_3, %c32] : memref<8x96xf32, #tpu.memory_space<vmem>>, vector<8x8xf32>
    %c0_4 = arith.constant 0 : index
    %c64 = arith.constant 64 : index
    %3 = vector.load %arg1[%c0_4, %c64] : memref<8x96xf32, #tpu.memory_space<vmem>>, vector<8x8xf32>
    %4 = arith.truncf %1 : vector<8x8xf32> to vector<8x8xbf16>
    %5 = arith.truncf %2 : vector<8x8xf32> to vector<8x8xbf16>
    %6 = arith.truncf %3 : vector<8x8xf32> to vector<8x8xbf16>
    %cst = arith.constant dense<0.000000e+00> : vector<8x8xf32>
    %7 = tpu.matmul %4, %5, %cst {dimension_numbers = #tpu.dot_dimension_numbers<[1], [1], [0], [0], [0, 0, 1, 0], [], []>} : vector<8x8xbf16>, vector<8x8xbf16>, vector<8x8xf32> -> vector<8x8xf32>
    %cst_5 = arith.constant 0.353553385 : f32
    %8 = vector.broadcast %cst_5 : f32 to vector<8x8xf32>
    %9 = arith.mulf %7, %8 : vector<8x8xf32>
    %10 = arith.addf %9, %0 : vector<8x8xf32>
    %cst_6 = arith.constant dense<0xFF800000> : vector<8xf32>
    %11 = vector.multi_reduction <maximumf>, %10, %cst_6 [1] : vector<8x8xf32> to vector<8xf32>
    %12 = vector.shape_cast %11 : vector<8xf32> to vector<8x1xf32>
    %13 = vector.broadcast %12 : vector<8x1xf32> to vector<8x8xf32>
    %14 = arith.subf %10, %13 : vector<8x8xf32>
    %15 = math.exp %14 : vector<8x8xf32>
    %cst_7 = arith.constant dense<0.000000e+00> : vector<8xf32>
    %16 = vector.multi_reduction <add>, %15, %cst_7 [1] : vector<8x8xf32> to vector<8xf32>
    %17 = vector.shape_cast %16 : vector<8xf32> to vector<8x1xf32>
    %18 = arith.truncf %15 : vector<8x8xf32> to vector<8x8xbf16>
    %cst_8 = arith.constant dense<0.000000e+00> : vector<8x8xf32>
    %19 = tpu.matmul %18, %6, %cst_8 {dimension_numbers = #tpu.dot_dimension_numbers<[1], [0], [0], [1], [0, 0, 1, 1], [], []>} : vector<8x8xbf16>, vector<8x8xbf16>, vector<8x8xf32> -> vector<8x8xf32>
    %20 = tpu.reciprocal %17 {approx = true} : vector<8x1xf32> -> vector<8x1xf32>
    %21 = vector.broadcast %20 : vector<8x1xf32> to vector<8x8xf32>
    %22 = arith.mulf %19, %21 : vector<8x8xf32>
    %c0_9 = arith.constant 0 : index
    %c8 = arith.constant 8 : index
    %23 = vector.load %arg1[%c0_9, %c8] : memref<8x96xf32, #tpu.memory_space<vmem>>, vector<8x8xf32>
    %c0_10 = arith.constant 0 : index
    %c40 = arith.constant 40 : index
    %24 = vector.load %arg1[%c0_10, %c40] : memref<8x96xf32, #tpu.memory_space<vmem>>, vector<8x8xf32>
    %c0_11 = arith.constant 0 : index
    %c72 = arith.constant 72 : index
    %25 = vector.load %arg1[%c0_11, %c72] : memref<8x96xf32, #tpu.memory_space<vmem>>, vector<8x8xf32>
    %26 = arith.truncf %23 : vector<8x8xf32> to vector<8x8xbf16>
    %27 = arith.truncf %24 : vector<8x8xf32> to vector<8x8xbf16>
    %28 = arith.truncf %25 : vector<8x8xf32> to vector<8x8xbf16>
    %cst_12 = arith.constant dense<0.000000e+00> : vector<8x8xf32>
    %29 = tpu.matmul %26, %27, %cst_12 {dimension_numbers = #tpu.dot_dimension_numbers<[1], [1], [0], [0], [0, 0, 1, 0], [], []>} : vector<8x8xbf16>, vector<8x8xbf16>, vector<8x8xf32> -> vector<8x8xf32>
    %cst_13 = arith.constant 0.353553385 : f32
    %30 = vector.broadcast %cst_13 : f32 to vector<8x8xf32>
    %31 = arith.mulf %29, %30 : vector<8x8xf32>
    %32 = arith.addf %31, %0 : vector<8x8xf32>
    %cst_14 = arith.constant dense<0xFF800000> : vector<8xf32>
    %33 = vector.multi_reduction <maximumf>, %32, %cst_14 [1] : vector<8x8xf32> to vector<8xf32>
    %34 = vector.shape_cast %33 : vector<8xf32> to vector<8x1xf32>
    %35 = vector.broadcast %34 : vector<8x1xf32> to vector<8x8xf32>
    %36 = arith.subf %32, %35 : vector<8x8xf32>
    %37 = math.exp %36 : vector<8x8xf32>
    %cst_15 = arith.constant dense<0.000000e+00> : vector<8xf32>
    %38 = vector.multi_reduction <add>, %37, %cst_15 [1] : vector<8x8xf32> to vector<8xf32>
    %39 = vector.shape_cast %38 : vector<8xf32> to vector<8x1xf32>
    %40 = arith.truncf %37 : vector<8x8xf32> to vector<8x8xbf16>
    %cst_16 = arith.constant dense<0.000000e+00> : vector<8x8xf32>
    %41 = tpu.matmul %40, %28, %cst_16 {dimension_numbers = #tpu.dot_dimension_numbers<[1], [0], [0], [1], [0, 0, 1, 1], [], []>} : vector<8x8xbf16>, vector<8x8xbf16>, vector<8x8xf32> -> vector<8x8xf32>
    %42 = tpu.reciprocal %39 {approx = true} : vector<8x1xf32> -> vector<8x1xf32>
    %43 = vector.broadcast %42 : vector<8x1xf32> to vector<8x8xf32>
    %44 = arith.mulf %41, %43 : vector<8x8xf32>
    %c0_17 = arith.constant 0 : index
    %c16 = arith.constant 16 : index
    %45 = vector.load %arg1[%c0_17, %c16] : memref<8x96xf32, #tpu.memory_space<vmem>>, vector<8x8xf32>
    %c0_18 = arith.constant 0 : index
    %c48 = arith.constant 48 : index
    %46 = vector.load %arg1[%c0_18, %c48] : memref<8x96xf32, #tpu.memory_space<vmem>>, vector<8x8xf32>
    %c0_19 = arith.constant 0 : index
    %c80 = arith.constant 80 : index
    %47 = vector.load %arg1[%c0_19, %c80] : memref<8x96xf32, #tpu.memory_space<vmem>>, vector<8x8xf32>
    %48 = arith.truncf %45 : vector<8x8xf32> to vector<8x8xbf16>
    %49 = arith.truncf %46 : vector<8x8xf32> to vector<8x8xbf16>
    %50 = arith.truncf %47 : vector<8x8xf32> to vector<8x8xbf16>
    %cst_20 = arith.constant dense<0.000000e+00> : vector<8x8xf32>
    %51 = tpu.matmul %48, %49, %cst_20 {dimension_numbers = #tpu.dot_dimension_numbers<[1], [1], [0], [0], [0, 0, 1, 0], [], []>} : vector<8x8xbf16>, vector<8x8xbf16>, vector<8x8xf32> -> vector<8x8xf32>
    %cst_21 = arith.constant 0.353553385 : f32
    %52 = vector.broadcast %cst_21 : f32 to vector<8x8xf32>
    %53 = arith.mulf %51, %52 : vector<8x8xf32>
    %54 = arith.addf %53, %0 : vector<8x8xf32>
    %cst_22 = arith.constant dense<0xFF800000> : vector<8xf32>
    %55 = vector.multi_reduction <maximumf>, %54, %cst_22 [1] : vector<8x8xf32> to vector<8xf32>
    %56 = vector.shape_cast %55 : vector<8xf32> to vector<8x1xf32>
    %57 = vector.broadcast %56 : vector<8x1xf32> to vector<8x8xf32>
    %58 = arith.subf %54, %57 : vector<8x8xf32>
    %59 = math.exp %58 : vector<8x8xf32>
    %cst_23 = arith.constant dense<0.000000e+00> : vector<8xf32>
    %60 = vector.multi_reduction <add>, %59, %cst_23 [1] : vector<8x8xf32> to vector<8xf32>
    %61 = vector.shape_cast %60 : vector<8xf32> to vector<8x1xf32>
    %62 = arith.truncf %59 : vector<8x8xf32> to vector<8x8xbf16>
    %cst_24 = arith.constant dense<0.000000e+00> : vector<8x8xf32>
    %63 = tpu.matmul %62, %50, %cst_24 {dimension_numbers = #tpu.dot_dimension_numbers<[1], [0], [0], [1], [0, 0, 1, 1], [], []>} : vector<8x8xbf16>, vector<8x8xbf16>, vector<8x8xf32> -> vector<8x8xf32>
    %64 = tpu.reciprocal %61 {approx = true} : vector<8x1xf32> -> vector<8x1xf32>
    %65 = vector.broadcast %64 : vector<8x1xf32> to vector<8x8xf32>
    %66 = arith.mulf %63, %65 : vector<8x8xf32>
    %c0_25 = arith.constant 0 : index
    %c24 = arith.constant 24 : index
    %67 = vector.load %arg1[%c0_25, %c24] : memref<8x96xf32, #tpu.memory_space<vmem>>, vector<8x8xf32>
    %c0_26 = arith.constant 0 : index
    %c56 = arith.constant 56 : index
    %68 = vector.load %arg1[%c0_26, %c56] : memref<8x96xf32, #tpu.memory_space<vmem>>, vector<8x8xf32>
    %c0_27 = arith.constant 0 : index
    %c88 = arith.constant 88 : index
    %69 = vector.load %arg1[%c0_27, %c88] : memref<8x96xf32, #tpu.memory_space<vmem>>, vector<8x8xf32>
    %70 = arith.truncf %67 : vector<8x8xf32> to vector<8x8xbf16>
    %71 = arith.truncf %68 : vector<8x8xf32> to vector<8x8xbf16>
    %72 = arith.truncf %69 : vector<8x8xf32> to vector<8x8xbf16>
    %cst_28 = arith.constant dense<0.000000e+00> : vector<8x8xf32>
    %73 = tpu.matmul %70, %71, %cst_28 {dimension_numbers = #tpu.dot_dimension_numbers<[1], [1], [0], [0], [0, 0, 1, 0], [], []>} : vector<8x8xbf16>, vector<8x8xbf16>, vector<8x8xf32> -> vector<8x8xf32>
    %cst_29 = arith.constant 0.353553385 : f32
    %74 = vector.broadcast %cst_29 : f32 to vector<8x8xf32>
    %75 = arith.mulf %73, %74 : vector<8x8xf32>
    %76 = arith.addf %75, %0 : vector<8x8xf32>
    %cst_30 = arith.constant dense<0xFF800000> : vector<8xf32>
    %77 = vector.multi_reduction <maximumf>, %76, %cst_30 [1] : vector<8x8xf32> to vector<8xf32>
    %78 = vector.shape_cast %77 : vector<8xf32> to vector<8x1xf32>
    %79 = vector.broadcast %78 : vector<8x1xf32> to vector<8x8xf32>
    %80 = arith.subf %76, %79 : vector<8x8xf32>
    %81 = math.exp %80 : vector<8x8xf32>
    %cst_31 = arith.constant dense<0.000000e+00> : vector<8xf32>
    %82 = vector.multi_reduction <add>, %81, %cst_31 [1] : vector<8x8xf32> to vector<8xf32>
    %83 = vector.shape_cast %82 : vector<8xf32> to vector<8x1xf32>
    %84 = arith.truncf %81 : vector<8x8xf32> to vector<8x8xbf16>
    %cst_32 = arith.constant dense<0.000000e+00> : vector<8x8xf32>
    %85 = tpu.matmul %84, %72, %cst_32 {dimension_numbers = #tpu.dot_dimension_numbers<[1], [0], [0], [1], [0, 0, 1, 1], [], []>} : vector<8x8xbf16>, vector<8x8xbf16>, vector<8x8xf32> -> vector<8x8xf32>
    %86 = tpu.reciprocal %83 {approx = true} : vector<8x1xf32> -> vector<8x1xf32>
    %87 = vector.broadcast %86 : vector<8x1xf32> to vector<8x8xf32>
    %88 = arith.mulf %85, %87 : vector<8x8xf32>
    %89 = tpu.concatenate %22, %44, %66, %88 in 1 : vector<8x8xf32>, vector<8x8xf32>, vector<8x8xf32>, vector<8x8xf32> -> vector<8x32xf32>
    %c0_33 = arith.constant 0 : index
    %c0_34 = arith.constant 0 : index
    %90 = vector.load %arg3[%c0_33, %c0_34] : memref<8x32xf32, #tpu.memory_space<vmem>>, vector<8x32xf32>
    tpu.vector_store %arg3[%c0_33, %c0_34], %89 {strides = array<i32>} : memref<8x32xf32, #tpu.memory_space<vmem>>, vector<8x32xf32>,
    return
  }
  func.func @transform_0(%arg0: i32) -> (i32, i32) {
    %c0_i32 = arith.constant 0 : i32
    %c0_i32_0 = arith.constant 0 : i32
    return %arg0, %c0_i32 : i32, i32
  }
  func.func @transform_1(%arg0: i32) -> (i32, i32) {
    %c0_i32 = arith.constant 0 : i32
    %c0_i32_0 = arith.constant 0 : i32
    %c0_i32_1 = arith.constant 0 : i32
    return %c0_i32, %c0_i32_0 : i32, i32
  }
  func.func @transform_2(%arg0: i32) -> (i32, i32) {
    %c0_i32 = arith.constant 0 : i32
    %c0_i32_0 = arith.constant 0 : i32
    return %arg0, %c0_i32 : i32, i32
  }
}

module attributes {stable_mosaic.version = 11 : i64} {
  func.func @_proj_add_ln_kernel(%arg0: i32, %arg1: memref<16x32xf32, #tpu.memory_space<vmem>>, %arg2: memref<32x32xbf16, #tpu.memory_space<vmem>>, %arg3: memref<1x32xf32, #tpu.memory_space<vmem>>, %arg4: memref<16x32xf32, #tpu.memory_space<vmem>>, %arg5: memref<1x32xf32, #tpu.memory_space<vmem>>, %arg6: memref<1x32xf32, #tpu.memory_space<vmem>>, %arg7: memref<16x32xf32, #tpu.memory_space<vmem>>) attributes {dimension_semantics = [#tpu.dimension_semantics<parallel>], iteration_bounds = array<i64: 1>, scalar_prefetch = 0 : i64, scratch_operands = 0 : i64, tpu.core_type = #tpu.core_type<tc>, window_params = [{transform_indices = @transform_0, window_bounds = array<i64: 16, 32>}, {pipeline_mode = #tpu.pipeline_mode<synchronous>, transform_indices = @transform_1, window_bounds = array<i64: 32, 32>}, {pipeline_mode = #tpu.pipeline_mode<synchronous>, transform_indices = @transform_2, window_bounds = array<i64: 1, 32>}, {transform_indices = @transform_3, window_bounds = array<i64: 16, 32>}, {pipeline_mode = #tpu.pipeline_mode<synchronous>, transform_indices = @transform_4, window_bounds = array<i64: 1, 32>}, {pipeline_mode = #tpu.pipeline_mode<synchronous>, transform_indices = @transform_5, window_bounds = array<i64: 1, 32>}, {transform_indices = @transform_6, window_bounds = array<i64: 16, 32>}]} {
    %c0 = arith.constant 0 : index
    %c0_0 = arith.constant 0 : index
    %0 = vector.load %arg1[%c0, %c0_0] : memref<16x32xf32, #tpu.memory_space<vmem>>, vector<16x32xf32>
    %1 = arith.truncf %0 : vector<16x32xf32> to vector<16x32xbf16>
    %c0_1 = arith.constant 0 : index
    %c0_2 = arith.constant 0 : index
    %2 = vector.load %arg2[%c0_1, %c0_2] : memref<32x32xbf16, #tpu.memory_space<vmem>>, vector<32x32xbf16>
    %cst = arith.constant dense<0.000000e+00> : vector<16x32xf32>
    %3 = tpu.matmul %1, %2, %cst {dimension_numbers = #tpu.dot_dimension_numbers<[1], [0], [0], [1], [0, 0, 1, 1], [], []>} : vector<16x32xbf16>, vector<32x32xbf16>, vector<16x32xf32> -> vector<16x32xf32>
    %c0_3 = arith.constant 0 : index
    %c0_4 = arith.constant 0 : index
    %4 = vector.load %arg3[%c0_3, %c0_4] : memref<1x32xf32, #tpu.memory_space<vmem>>, vector<1x32xf32>
    %5 = vector.broadcast %4 : vector<1x32xf32> to vector<16x32xf32>
    %6 = arith.addf %3, %5 : vector<16x32xf32>
    %c0_5 = arith.constant 0 : index
    %c0_6 = arith.constant 0 : index
    %7 = vector.load %arg4[%c0_5, %c0_6] : memref<16x32xf32, #tpu.memory_space<vmem>>, vector<16x32xf32>
    %8 = arith.addf %6, %7 : vector<16x32xf32>
    %cst_7 = arith.constant dense<0.000000e+00> : vector<16xf32>
    %9 = vector.multi_reduction <add>, %8, %cst_7 [1] : vector<16x32xf32> to vector<16xf32>
    %10 = vector.shape_cast %9 : vector<16xf32> to vector<16x1xf32>
    %cst_8 = arith.constant 3.200000e+01 : f32
    %11 = vector.broadcast %cst_8 : f32 to vector<16x1xf32>
    %12 = arith.divf %10, %11 : vector<16x1xf32>
    %13 = vector.broadcast %12 : vector<16x1xf32> to vector<16x32xf32>
    %14 = arith.subf %8, %13 : vector<16x32xf32>
    %15 = arith.mulf %14, %14 : vector<16x32xf32>
    %cst_9 = arith.constant dense<0.000000e+00> : vector<16xf32>
    %16 = vector.multi_reduction <add>, %15, %cst_9 [1] : vector<16x32xf32> to vector<16xf32>
    %17 = vector.shape_cast %16 : vector<16xf32> to vector<16x1xf32>
    %cst_10 = arith.constant 3.200000e+01 : f32
    %18 = vector.broadcast %cst_10 : f32 to vector<16x1xf32>
    %19 = arith.divf %17, %18 : vector<16x1xf32>
    %20 = vector.broadcast %12 : vector<16x1xf32> to vector<16x32xf32>
    %21 = arith.subf %8, %20 : vector<16x32xf32>
    %cst_11 = arith.constant 9.99999974E-6 : f32
    %22 = vector.broadcast %cst_11 : f32 to vector<16x1xf32>
    %23 = arith.addf %19, %22 : vector<16x1xf32>
    %24 = math.rsqrt %23 : vector<16x1xf32>
    %25 = vector.broadcast %24 : vector<16x1xf32> to vector<16x32xf32>
    %26 = arith.mulf %21, %25 : vector<16x32xf32>
    %c0_12 = arith.constant 0 : index
    %c0_13 = arith.constant 0 : index
    %27 = vector.load %arg5[%c0_12, %c0_13] : memref<1x32xf32, #tpu.memory_space<vmem>>, vector<1x32xf32>
    %28 = vector.broadcast %27 : vector<1x32xf32> to vector<16x32xf32>
    %29 = arith.mulf %26, %28 : vector<16x32xf32>
    %c0_14 = arith.constant 0 : index
    %c0_15 = arith.constant 0 : index
    %30 = vector.load %arg6[%c0_14, %c0_15] : memref<1x32xf32, #tpu.memory_space<vmem>>, vector<1x32xf32>
    %31 = vector.broadcast %30 : vector<1x32xf32> to vector<16x32xf32>
    %32 = arith.addf %29, %31 : vector<16x32xf32>
    %c0_16 = arith.constant 0 : index
    %c0_17 = arith.constant 0 : index
    %33 = vector.load %arg7[%c0_16, %c0_17] : memref<16x32xf32, #tpu.memory_space<vmem>>, vector<16x32xf32>
    tpu.vector_store %arg7[%c0_16, %c0_17], %32 {strides = array<i32>} : memref<16x32xf32, #tpu.memory_space<vmem>>, vector<16x32xf32>,
    return
  }
  func.func @transform_0(%arg0: i32) -> (i32, i32) {
    %c0_i32 = arith.constant 0 : i32
    %c0_i32_0 = arith.constant 0 : i32
    return %arg0, %c0_i32 : i32, i32
  }
  func.func @transform_1(%arg0: i32) -> (i32, i32) {
    %c0_i32 = arith.constant 0 : i32
    %c0_i32_0 = arith.constant 0 : i32
    %c0_i32_1 = arith.constant 0 : i32
    return %c0_i32, %c0_i32_0 : i32, i32
  }
  func.func @transform_2(%arg0: i32) -> (i32, i32) {
    %c0_i32 = arith.constant 0 : i32
    %c0_i32_0 = arith.constant 0 : i32
    %c0_i32_1 = arith.constant 0 : i32
    return %c0_i32, %c0_i32_0 : i32, i32
  }
  func.func @transform_3(%arg0: i32) -> (i32, i32) {
    %c0_i32 = arith.constant 0 : i32
    %c0_i32_0 = arith.constant 0 : i32
    return %arg0, %c0_i32 : i32, i32
  }
  func.func @transform_4(%arg0: i32) -> (i32, i32) {
    %c0_i32 = arith.constant 0 : i32
    %c0_i32_0 = arith.constant 0 : i32
    %c0_i32_1 = arith.constant 0 : i32
    return %c0_i32, %c0_i32_0 : i32, i32
  }
  func.func @transform_5(%arg0: i32) -> (i32, i32) {
    %c0_i32 = arith.constant 0 : i32
    %c0_i32_0 = arith.constant 0 : i32
    %c0_i32_1 = arith.constant 0 : i32
    return %c0_i32, %c0_i32_0 : i32, i32
  }
  func.func @transform_6(%arg0: i32) -> (i32, i32) {
    %c0_i32 = arith.constant 0 : i32
    %c0_i32_0 = arith.constant 0 : i32
    return %arg0, %c0_i32 : i32, i32
  }
}

module attributes {stable_mosaic.version = 11 : i64} {
  func.func @_matmul_bias_kernel(%arg0: i32, %arg1: i32, %arg2: i32, %arg3: memref<16x32xf32, #tpu.memory_space<vmem>>, %arg4: memref<32x32xbf16, #tpu.memory_space<vmem>>, %arg5: memref<1x32xf32, #tpu.memory_space<vmem>>, %arg6: memref<16x32xf32, #tpu.memory_space<vmem>>, %arg7: memref<16x32xf32, #tpu.memory_space<vmem>>) attributes {dimension_semantics = [#tpu.dimension_semantics<parallel>, #tpu.dimension_semantics<parallel>, #tpu.dimension_semantics<arbitrary>], iteration_bounds = array<i64: 1, 1, 1>, scalar_prefetch = 0 : i64, scratch_operands = 1 : i64, tpu.core_type = #tpu.core_type<tc>, window_params = [{transform_indices = @transform_0, window_bounds = array<i64: 16, 32>}, {transform_indices = @transform_1, window_bounds = array<i64: 32, 32>}, {transform_indices = @transform_2, window_bounds = array<i64: 1, 32>}, {transform_indices = @transform_3, window_bounds = array<i64: 16, 32>}]} {
    %c0_i32 = arith.constant 0 : i32
    %0 = arith.cmpi eq, %arg2, %c0_i32 : i32
    %1 = arith.extui %0 : i1 to i32
    %c0_i32_0 = arith.constant 0 : i32
    %2 = arith.cmpi ne, %1, %c0_i32_0 : i32
    scf.if %2 {
      %cst_10 = arith.constant 0.000000e+00 : f32
      %13 = vector.broadcast %cst_10 : f32 to vector<16x32xf32>
      %c0_11 = arith.constant 0 : index
      %c0_12 = arith.constant 0 : index
      %14 = vector.load %arg7[%c0_11, %c0_12] : memref<16x32xf32, #tpu.memory_space<vmem>>, vector<16x32xf32>
      tpu.vector_store %arg7[%c0_11, %c0_12], %13 {strides = array<i32>} : memref<16x32xf32, #tpu.memory_space<vmem>>, vector<16x32xf32>,
    } else {
    }
    %c0 = arith.constant 0 : index
    %c0_1 = arith.constant 0 : index
    %3 = vector.load %arg7[%c0, %c0_1] : memref<16x32xf32, #tpu.memory_space<vmem>>, vector<16x32xf32>
    %c0_2 = arith.constant 0 : index
    %c0_3 = arith.constant 0 : index
    %4 = vector.load %arg3[%c0_2, %c0_3] : memref<16x32xf32, #tpu.memory_space<vmem>>, vector<16x32xf32>
    %5 = arith.truncf %4 : vector<16x32xf32> to vector<16x32xbf16>
    %c0_4 = arith.constant 0 : index
    %c0_5 = arith.constant 0 : index
    %6 = vector.load %arg4[%c0_4, %c0_5] : memref<32x32xbf16, #tpu.memory_space<vmem>>, vector<32x32xbf16>
    %cst = arith.constant dense<0.000000e+00> : vector<16x32xf32>
    %7 = tpu.matmul %5, %6, %cst {dimension_numbers = #tpu.dot_dimension_numbers<[1], [0], [0], [1], [0, 0, 1, 1], [], []>} : vector<16x32xbf16>, vector<32x32xbf16>, vector<16x32xf32> -> vector<16x32xf32>
    %8 = arith.addf %3, %7 : vector<16x32xf32>
    %c0_6 = arith.constant 0 : index
    %c0_7 = arith.constant 0 : index
    %9 = vector.load %arg7[%c0_6, %c0_7] : memref<16x32xf32, #tpu.memory_space<vmem>>, vector<16x32xf32>
    tpu.vector_store %arg7[%c0_6, %c0_7], %8 {strides = array<i32>} : memref<16x32xf32, #tpu.memory_space<vmem>>, vector<16x32xf32>,
    %c0_i32_8 = arith.constant 0 : i32
    %10 = arith.cmpi eq, %arg2, %c0_i32_8 : i32
    %11 = arith.extui %10 : i1 to i32
    %c0_i32_9 = arith.constant 0 : i32
    %12 = arith.cmpi ne, %11, %c0_i32_9 : i32
    scf.if %12 {
      %c0_10 = arith.constant 0 : index
      %c0_11 = arith.constant 0 : index
      %13 = vector.load %arg7[%c0_10, %c0_11] : memref<16x32xf32, #tpu.memory_space<vmem>>, vector<16x32xf32>
      %c0_12 = arith.constant 0 : index
      %c0_13 = arith.constant 0 : index
      %14 = vector.load %arg5[%c0_12, %c0_13] : memref<1x32xf32, #tpu.memory_space<vmem>>, vector<1x32xf32>
      %15 = vector.broadcast %14 : vector<1x32xf32> to vector<16x32xf32>
      %16 = arith.addf %13, %15 : vector<16x32xf32>
      %c0_14 = arith.constant 0 : index
      %c0_15 = arith.constant 0 : index
      %17 = vector.load %arg6[%c0_14, %c0_15] : memref<16x32xf32, #tpu.memory_space<vmem>>, vector<16x32xf32>
      tpu.vector_store %arg6[%c0_14, %c0_15], %16 {strides = array<i32>} : memref<16x32xf32, #tpu.memory_space<vmem>>, vector<16x32xf32>,
    } else {
    }
    return
  }
  func.func @transform_0(%arg0: i32, %arg1: i32, %arg2: i32) -> (i32, i32) {
    %c0_i32 = arith.constant 0 : i32
    return %arg0, %arg2 : i32, i32
  }
  func.func @transform_1(%arg0: i32, %arg1: i32, %arg2: i32) -> (i32, i32) {
    %c0_i32 = arith.constant 0 : i32
    return %arg2, %arg1 : i32, i32
  }
  func.func @transform_2(%arg0: i32, %arg1: i32, %arg2: i32) -> (i32, i32) {
    %c0_i32 = arith.constant 0 : i32
    %c0_i32_0 = arith.constant 0 : i32
    return %c0_i32, %arg1 : i32, i32
  }
  func.func @transform_3(%arg0: i32, %arg1: i32, %arg2: i32) -> (i32, i32) {
    %c0_i32 = arith.constant 0 : i32
    return %arg0, %arg1 : i32, i32
  }
}

module attributes {stable_mosaic.version = 11 : i64} {
  func.func @_matmul_bias_kernel(%arg0: i32, %arg1: i32, %arg2: i32, %arg3: memref<16x32xf32, #tpu.memory_space<vmem>>, %arg4: memref<32x64xbf16, #tpu.memory_space<vmem>>, %arg5: memref<1x64xf32, #tpu.memory_space<vmem>>, %arg6: memref<16x64xf32, #tpu.memory_space<vmem>>, %arg7: memref<16x64xf32, #tpu.memory_space<vmem>>) attributes {dimension_semantics = [#tpu.dimension_semantics<parallel>, #tpu.dimension_semantics<parallel>, #tpu.dimension_semantics<arbitrary>], iteration_bounds = array<i64: 1, 1, 1>, scalar_prefetch = 0 : i64, scratch_operands = 1 : i64, tpu.core_type = #tpu.core_type<tc>, window_params = [{transform_indices = @transform_0, window_bounds = array<i64: 16, 32>}, {transform_indices = @transform_1, window_bounds = array<i64: 32, 64>}, {transform_indices = @transform_2, window_bounds = array<i64: 1, 64>}, {transform_indices = @transform_3, window_bounds = array<i64: 16, 64>}]} {
    %c0_i32 = arith.constant 0 : i32
    %0 = arith.cmpi eq, %arg2, %c0_i32 : i32
    %1 = arith.extui %0 : i1 to i32
    %c0_i32_0 = arith.constant 0 : i32
    %2 = arith.cmpi ne, %1, %c0_i32_0 : i32
    scf.if %2 {
      %cst_10 = arith.constant 0.000000e+00 : f32
      %13 = vector.broadcast %cst_10 : f32 to vector<16x64xf32>
      %c0_11 = arith.constant 0 : index
      %c0_12 = arith.constant 0 : index
      %14 = vector.load %arg7[%c0_11, %c0_12] : memref<16x64xf32, #tpu.memory_space<vmem>>, vector<16x64xf32>
      tpu.vector_store %arg7[%c0_11, %c0_12], %13 {strides = array<i32>} : memref<16x64xf32, #tpu.memory_space<vmem>>, vector<16x64xf32>,
    } else {
    }
    %c0 = arith.constant 0 : index
    %c0_1 = arith.constant 0 : index
    %3 = vector.load %arg7[%c0, %c0_1] : memref<16x64xf32, #tpu.memory_space<vmem>>, vector<16x64xf32>
    %c0_2 = arith.constant 0 : index
    %c0_3 = arith.constant 0 : index
    %4 = vector.load %arg3[%c0_2, %c0_3] : memref<16x32xf32, #tpu.memory_space<vmem>>, vector<16x32xf32>
    %5 = arith.truncf %4 : vector<16x32xf32> to vector<16x32xbf16>
    %c0_4 = arith.constant 0 : index
    %c0_5 = arith.constant 0 : index
    %6 = vector.load %arg4[%c0_4, %c0_5] : memref<32x64xbf16, #tpu.memory_space<vmem>>, vector<32x64xbf16>
    %cst = arith.constant dense<0.000000e+00> : vector<16x64xf32>
    %7 = tpu.matmul %5, %6, %cst {dimension_numbers = #tpu.dot_dimension_numbers<[1], [0], [0], [1], [0, 0, 1, 1], [], []>} : vector<16x32xbf16>, vector<32x64xbf16>, vector<16x64xf32> -> vector<16x64xf32>
    %8 = arith.addf %3, %7 : vector<16x64xf32>
    %c0_6 = arith.constant 0 : index
    %c0_7 = arith.constant 0 : index
    %9 = vector.load %arg7[%c0_6, %c0_7] : memref<16x64xf32, #tpu.memory_space<vmem>>, vector<16x64xf32>
    tpu.vector_store %arg7[%c0_6, %c0_7], %8 {strides = array<i32>} : memref<16x64xf32, #tpu.memory_space<vmem>>, vector<16x64xf32>,
    %c0_i32_8 = arith.constant 0 : i32
    %10 = arith.cmpi eq, %arg2, %c0_i32_8 : i32
    %11 = arith.extui %10 : i1 to i32
    %c0_i32_9 = arith.constant 0 : i32
    %12 = arith.cmpi ne, %11, %c0_i32_9 : i32
    scf.if %12 {
      %c0_10 = arith.constant 0 : index
      %c0_11 = arith.constant 0 : index
      %13 = vector.load %arg7[%c0_10, %c0_11] : memref<16x64xf32, #tpu.memory_space<vmem>>, vector<16x64xf32>
      %c0_12 = arith.constant 0 : index
      %c0_13 = arith.constant 0 : index
      %14 = vector.load %arg5[%c0_12, %c0_13] : memref<1x64xf32, #tpu.memory_space<vmem>>, vector<1x64xf32>
      %15 = vector.broadcast %14 : vector<1x64xf32> to vector<16x64xf32>
      %16 = arith.addf %13, %15 : vector<16x64xf32>
      %c0_14 = arith.constant 0 : index
      %c0_15 = arith.constant 0 : index
      %17 = vector.load %arg6[%c0_14, %c0_15] : memref<16x64xf32, #tpu.memory_space<vmem>>, vector<16x64xf32>
      tpu.vector_store %arg6[%c0_14, %c0_15], %16 {strides = array<i32>} : memref<16x64xf32, #tpu.memory_space<vmem>>, vector<16x64xf32>,
    } else {
    }
    return
  }
  func.func @transform_0(%arg0: i32, %arg1: i32, %arg2: i32) -> (i32, i32) {
    %c0_i32 = arith.constant 0 : i32
    return %arg0, %arg2 : i32, i32
  }
  func.func @transform_1(%arg0: i32, %arg1: i32, %arg2: i32) -> (i32, i32) {
    %c0_i32 = arith.constant 0 : i32
    return %arg2, %arg1 : i32, i32
  }
  func.func @transform_2(%arg0: i32, %arg1: i32, %arg2: i32) -> (i32, i32) {
    %c0_i32 = arith.constant 0 : i32
    %c0_i32_0 = arith.constant 0 : i32
    return %c0_i32, %arg1 : i32, i32
  }
  func.func @transform_3(%arg0: i32, %arg1: i32, %arg2: i32) -> (i32, i32) {
    %c0_i32 = arith.constant 0 : i32
    return %arg0, %arg1 : i32, i32
  }
}

module attributes {stable_mosaic.version = 11 : i64} {
  func.func @_mha_kernel(%arg0: i32, %arg1: memref<8x32xf32, #tpu.memory_space<vmem>>, %arg2: memref<8x64xf32, #tpu.memory_space<vmem>>, %arg3: memref<8x32xf32, #tpu.memory_space<vmem>>) attributes {dimension_semantics = [#tpu.dimension_semantics<parallel>], iteration_bounds = array<i64: 2>, scalar_prefetch = 0 : i64, scratch_operands = 0 : i64, tpu.core_type = #tpu.core_type<tc>, window_params = [{transform_indices = @transform_0, window_bounds = array<i64: 8, 32>}, {transform_indices = @transform_1, window_bounds = array<i64: 8, 64>}, {transform_indices = @transform_2, window_bounds = array<i64: 8, 32>}]} {
    %c0 = arith.constant 0 : index
    %c0_0 = arith.constant 0 : index
    %0 = vector.load %arg1[%c0, %c0_0] : memref<8x32xf32, #tpu.memory_space<vmem>>, vector<8x8xf32>
    %c0_1 = arith.constant 0 : index
    %c0_2 = arith.constant 0 : index
    %1 = vector.load %arg2[%c0_1, %c0_2] : memref<8x64xf32, #tpu.memory_space<vmem>>, vector<8x8xf32>
    %c0_3 = arith.constant 0 : index
    %c32 = arith.constant 32 : index
    %2 = vector.load %arg2[%c0_3, %c32] : memref<8x64xf32, #tpu.memory_space<vmem>>, vector<8x8xf32>
    %3 = arith.truncf %0 : vector<8x8xf32> to vector<8x8xbf16>
    %4 = arith.truncf %1 : vector<8x8xf32> to vector<8x8xbf16>
    %5 = arith.truncf %2 : vector<8x8xf32> to vector<8x8xbf16>
    %cst = arith.constant dense<0.000000e+00> : vector<8x8xf32>
    %6 = tpu.matmul %3, %4, %cst {dimension_numbers = #tpu.dot_dimension_numbers<[1], [1], [0], [0], [0, 0, 1, 0], [], []>} : vector<8x8xbf16>, vector<8x8xbf16>, vector<8x8xf32> -> vector<8x8xf32>
    %cst_4 = arith.constant 0.353553385 : f32
    %7 = vector.broadcast %cst_4 : f32 to vector<8x8xf32>
    %8 = arith.mulf %6, %7 : vector<8x8xf32>
    %cst_5 = arith.constant dense<0xFF800000> : vector<8xf32>
    %9 = vector.multi_reduction <maximumf>, %8, %cst_5 [1] : vector<8x8xf32> to vector<8xf32>
    %10 = vector.shape_cast %9 : vector<8xf32> to vector<8x1xf32>
    %11 = vector.broadcast %10 : vector<8x1xf32> to vector<8x8xf32>
    %12 = arith.subf %8, %11 : vector<8x8xf32>
    %13 = math.exp %12 : vector<8x8xf32>
    %cst_6 = arith.constant dense<0.000000e+00> : vector<8xf32>
    %14 = vector.multi_reduction <add>, %13, %cst_6 [1] : vector<8x8xf32> to vector<8xf32>
    %15 = vector.shape_cast %14 : vector<8xf32> to vector<8x1xf32>
    %16 = arith.truncf %13 : vector<8x8xf32> to vector<8x8xbf16>
    %cst_7 = arith.constant dense<0.000000e+00> : vector<8x8xf32>
    %17 = tpu.matmul %16, %5, %cst_7 {dimension_numbers = #tpu.dot_dimension_numbers<[1], [0], [0], [1], [0, 0, 1, 1], [], []>} : vector<8x8xbf16>, vector<8x8xbf16>, vector<8x8xf32> -> vector<8x8xf32>
    %18 = tpu.reciprocal %15 {approx = true} : vector<8x1xf32> -> vector<8x1xf32>
    %19 = vector.broadcast %18 : vector<8x1xf32> to vector<8x8xf32>
    %20 = arith.mulf %17, %19 : vector<8x8xf32>
    %c0_8 = arith.constant 0 : index
    %c8 = arith.constant 8 : index
    %21 = vector.load %arg1[%c0_8, %c8] : memref<8x32xf32, #tpu.memory_space<vmem>>, vector<8x8xf32>
    %c0_9 = arith.constant 0 : index
    %c8_10 = arith.constant 8 : index
    %22 = vector.load %arg2[%c0_9, %c8_10] : memref<8x64xf32, #tpu.memory_space<vmem>>, vector<8x8xf32>
    %c0_11 = arith.constant 0 : index
    %c40 = arith.constant 40 : index
    %23 = vector.load %arg2[%c0_11, %c40] : memref<8x64xf32, #tpu.memory_space<vmem>>, vector<8x8xf32>
    %24 = arith.truncf %21 : vector<8x8xf32> to vector<8x8xbf16>
    %25 = arith.truncf %22 : vector<8x8xf32> to vector<8x8xbf16>
    %26 = arith.truncf %23 : vector<8x8xf32> to vector<8x8xbf16>
    %cst_12 = arith.constant dense<0.000000e+00> : vector<8x8xf32>
    %27 = tpu.matmul %24, %25, %cst_12 {dimension_numbers = #tpu.dot_dimension_numbers<[1], [1], [0], [0], [0, 0, 1, 0], [], []>} : vector<8x8xbf16>, vector<8x8xbf16>, vector<8x8xf32> -> vector<8x8xf32>
    %cst_13 = arith.constant 0.353553385 : f32
    %28 = vector.broadcast %cst_13 : f32 to vector<8x8xf32>
    %29 = arith.mulf %27, %28 : vector<8x8xf32>
    %cst_14 = arith.constant dense<0xFF800000> : vector<8xf32>
    %30 = vector.multi_reduction <maximumf>, %29, %cst_14 [1] : vector<8x8xf32> to vector<8xf32>
    %31 = vector.shape_cast %30 : vector<8xf32> to vector<8x1xf32>
    %32 = vector.broadcast %31 : vector<8x1xf32> to vector<8x8xf32>
    %33 = arith.subf %29, %32 : vector<8x8xf32>
    %34 = math.exp %33 : vector<8x8xf32>
    %cst_15 = arith.constant dense<0.000000e+00> : vector<8xf32>
    %35 = vector.multi_reduction <add>, %34, %cst_15 [1] : vector<8x8xf32> to vector<8xf32>
    %36 = vector.shape_cast %35 : vector<8xf32> to vector<8x1xf32>
    %37 = arith.truncf %34 : vector<8x8xf32> to vector<8x8xbf16>
    %cst_16 = arith.constant dense<0.000000e+00> : vector<8x8xf32>
    %38 = tpu.matmul %37, %26, %cst_16 {dimension_numbers = #tpu.dot_dimension_numbers<[1], [0], [0], [1], [0, 0, 1, 1], [], []>} : vector<8x8xbf16>, vector<8x8xbf16>, vector<8x8xf32> -> vector<8x8xf32>
    %39 = tpu.reciprocal %36 {approx = true} : vector<8x1xf32> -> vector<8x1xf32>
    %40 = vector.broadcast %39 : vector<8x1xf32> to vector<8x8xf32>
    %41 = arith.mulf %38, %40 : vector<8x8xf32>
    %c0_17 = arith.constant 0 : index
    %c16 = arith.constant 16 : index
    %42 = vector.load %arg1[%c0_17, %c16] : memref<8x32xf32, #tpu.memory_space<vmem>>, vector<8x8xf32>
    %c0_18 = arith.constant 0 : index
    %c16_19 = arith.constant 16 : index
    %43 = vector.load %arg2[%c0_18, %c16_19] : memref<8x64xf32, #tpu.memory_space<vmem>>, vector<8x8xf32>
    %c0_20 = arith.constant 0 : index
    %c48 = arith.constant 48 : index
    %44 = vector.load %arg2[%c0_20, %c48] : memref<8x64xf32, #tpu.memory_space<vmem>>, vector<8x8xf32>
    %45 = arith.truncf %42 : vector<8x8xf32> to vector<8x8xbf16>
    %46 = arith.truncf %43 : vector<8x8xf32> to vector<8x8xbf16>
    %47 = arith.truncf %44 : vector<8x8xf32> to vector<8x8xbf16>
    %cst_21 = arith.constant dense<0.000000e+00> : vector<8x8xf32>
    %48 = tpu.matmul %45, %46, %cst_21 {dimension_numbers = #tpu.dot_dimension_numbers<[1], [1], [0], [0], [0, 0, 1, 0], [], []>} : vector<8x8xbf16>, vector<8x8xbf16>, vector<8x8xf32> -> vector<8x8xf32>
    %cst_22 = arith.constant 0.353553385 : f32
    %49 = vector.broadcast %cst_22 : f32 to vector<8x8xf32>
    %50 = arith.mulf %48, %49 : vector<8x8xf32>
    %cst_23 = arith.constant dense<0xFF800000> : vector<8xf32>
    %51 = vector.multi_reduction <maximumf>, %50, %cst_23 [1] : vector<8x8xf32> to vector<8xf32>
    %52 = vector.shape_cast %51 : vector<8xf32> to vector<8x1xf32>
    %53 = vector.broadcast %52 : vector<8x1xf32> to vector<8x8xf32>
    %54 = arith.subf %50, %53 : vector<8x8xf32>
    %55 = math.exp %54 : vector<8x8xf32>
    %cst_24 = arith.constant dense<0.000000e+00> : vector<8xf32>
    %56 = vector.multi_reduction <add>, %55, %cst_24 [1] : vector<8x8xf32> to vector<8xf32>
    %57 = vector.shape_cast %56 : vector<8xf32> to vector<8x1xf32>
    %58 = arith.truncf %55 : vector<8x8xf32> to vector<8x8xbf16>
    %cst_25 = arith.constant dense<0.000000e+00> : vector<8x8xf32>
    %59 = tpu.matmul %58, %47, %cst_25 {dimension_numbers = #tpu.dot_dimension_numbers<[1], [0], [0], [1], [0, 0, 1, 1], [], []>} : vector<8x8xbf16>, vector<8x8xbf16>, vector<8x8xf32> -> vector<8x8xf32>
    %60 = tpu.reciprocal %57 {approx = true} : vector<8x1xf32> -> vector<8x1xf32>
    %61 = vector.broadcast %60 : vector<8x1xf32> to vector<8x8xf32>
    %62 = arith.mulf %59, %61 : vector<8x8xf32>
    %c0_26 = arith.constant 0 : index
    %c24 = arith.constant 24 : index
    %63 = vector.load %arg1[%c0_26, %c24] : memref<8x32xf32, #tpu.memory_space<vmem>>, vector<8x8xf32>
    %c0_27 = arith.constant 0 : index
    %c24_28 = arith.constant 24 : index
    %64 = vector.load %arg2[%c0_27, %c24_28] : memref<8x64xf32, #tpu.memory_space<vmem>>, vector<8x8xf32>
    %c0_29 = arith.constant 0 : index
    %c56 = arith.constant 56 : index
    %65 = vector.load %arg2[%c0_29, %c56] : memref<8x64xf32, #tpu.memory_space<vmem>>, vector<8x8xf32>
    %66 = arith.truncf %63 : vector<8x8xf32> to vector<8x8xbf16>
    %67 = arith.truncf %64 : vector<8x8xf32> to vector<8x8xbf16>
    %68 = arith.truncf %65 : vector<8x8xf32> to vector<8x8xbf16>
    %cst_30 = arith.constant dense<0.000000e+00> : vector<8x8xf32>
    %69 = tpu.matmul %66, %67, %cst_30 {dimension_numbers = #tpu.dot_dimension_numbers<[1], [1], [0], [0], [0, 0, 1, 0], [], []>} : vector<8x8xbf16>, vector<8x8xbf16>, vector<8x8xf32> -> vector<8x8xf32>
    %cst_31 = arith.constant 0.353553385 : f32
    %70 = vector.broadcast %cst_31 : f32 to vector<8x8xf32>
    %71 = arith.mulf %69, %70 : vector<8x8xf32>
    %cst_32 = arith.constant dense<0xFF800000> : vector<8xf32>
    %72 = vector.multi_reduction <maximumf>, %71, %cst_32 [1] : vector<8x8xf32> to vector<8xf32>
    %73 = vector.shape_cast %72 : vector<8xf32> to vector<8x1xf32>
    %74 = vector.broadcast %73 : vector<8x1xf32> to vector<8x8xf32>
    %75 = arith.subf %71, %74 : vector<8x8xf32>
    %76 = math.exp %75 : vector<8x8xf32>
    %cst_33 = arith.constant dense<0.000000e+00> : vector<8xf32>
    %77 = vector.multi_reduction <add>, %76, %cst_33 [1] : vector<8x8xf32> to vector<8xf32>
    %78 = vector.shape_cast %77 : vector<8xf32> to vector<8x1xf32>
    %79 = arith.truncf %76 : vector<8x8xf32> to vector<8x8xbf16>
    %cst_34 = arith.constant dense<0.000000e+00> : vector<8x8xf32>
    %80 = tpu.matmul %79, %68, %cst_34 {dimension_numbers = #tpu.dot_dimension_numbers<[1], [0], [0], [1], [0, 0, 1, 1], [], []>} : vector<8x8xbf16>, vector<8x8xbf16>, vector<8x8xf32> -> vector<8x8xf32>
    %81 = tpu.reciprocal %78 {approx = true} : vector<8x1xf32> -> vector<8x1xf32>
    %82 = vector.broadcast %81 : vector<8x1xf32> to vector<8x8xf32>
    %83 = arith.mulf %80, %82 : vector<8x8xf32>
    %84 = tpu.concatenate %20, %41, %62, %83 in 1 : vector<8x8xf32>, vector<8x8xf32>, vector<8x8xf32>, vector<8x8xf32> -> vector<8x32xf32>
    %c0_35 = arith.constant 0 : index
    %c0_36 = arith.constant 0 : index
    %85 = vector.load %arg3[%c0_35, %c0_36] : memref<8x32xf32, #tpu.memory_space<vmem>>, vector<8x32xf32>
    tpu.vector_store %arg3[%c0_35, %c0_36], %84 {strides = array<i32>} : memref<8x32xf32, #tpu.memory_space<vmem>>, vector<8x32xf32>,
    return
  }
  func.func @transform_0(%arg0: i32) -> (i32, i32) {
    %c0_i32 = arith.constant 0 : i32
    %c0_i32_0 = arith.constant 0 : i32
    return %arg0, %c0_i32 : i32, i32
  }
  func.func @transform_1(%arg0: i32) -> (i32, i32) {
    %c0_i32 = arith.constant 0 : i32
    %c0_i32_0 = arith.constant 0 : i32
    return %arg0, %c0_i32 : i32, i32
  }
  func.func @transform_2(%arg0: i32) -> (i32, i32) {
    %c0_i32 = arith.constant 0 : i32
    %c0_i32_0 = arith.constant 0 : i32
    return %arg0, %c0_i32 : i32, i32
  }
}

module attributes {stable_mosaic.version = 11 : i64} {
  func.func @_ffn_add_ln_kernel(%arg0: i32, %arg1: memref<16x32xf32, #tpu.memory_space<vmem>>, %arg2: memref<32x64xbf16, #tpu.memory_space<vmem>>, %arg3: memref<1x64xf32, #tpu.memory_space<vmem>>, %arg4: memref<64x32xbf16, #tpu.memory_space<vmem>>, %arg5: memref<1x32xf32, #tpu.memory_space<vmem>>, %arg6: memref<1x32xf32, #tpu.memory_space<vmem>>, %arg7: memref<1x32xf32, #tpu.memory_space<vmem>>, %arg8: memref<16x32xf32, #tpu.memory_space<vmem>>) attributes {dimension_semantics = [#tpu.dimension_semantics<parallel>], iteration_bounds = array<i64: 1>, scalar_prefetch = 0 : i64, scratch_operands = 0 : i64, tpu.core_type = #tpu.core_type<tc>, window_params = [{transform_indices = @transform_0, window_bounds = array<i64: 16, 32>}, {pipeline_mode = #tpu.pipeline_mode<synchronous>, transform_indices = @transform_1, window_bounds = array<i64: 32, 64>}, {pipeline_mode = #tpu.pipeline_mode<synchronous>, transform_indices = @transform_2, window_bounds = array<i64: 1, 64>}, {pipeline_mode = #tpu.pipeline_mode<synchronous>, transform_indices = @transform_3, window_bounds = array<i64: 64, 32>}, {pipeline_mode = #tpu.pipeline_mode<synchronous>, transform_indices = @transform_4, window_bounds = array<i64: 1, 32>}, {pipeline_mode = #tpu.pipeline_mode<synchronous>, transform_indices = @transform_5, window_bounds = array<i64: 1, 32>}, {pipeline_mode = #tpu.pipeline_mode<synchronous>, transform_indices = @transform_6, window_bounds = array<i64: 1, 32>}, {transform_indices = @transform_7, window_bounds = array<i64: 16, 32>}]} {
    %c0 = arith.constant 0 : index
    %c0_0 = arith.constant 0 : index
    %0 = vector.load %arg1[%c0, %c0_0] : memref<16x32xf32, #tpu.memory_space<vmem>>, vector<16x32xf32>
    %1 = arith.truncf %0 : vector<16x32xf32> to vector<16x32xbf16>
    %c0_1 = arith.constant 0 : index
    %c0_2 = arith.constant 0 : index
    %2 = vector.load %arg2[%c0_1, %c0_2] : memref<32x64xbf16, #tpu.memory_space<vmem>>, vector<32x64xbf16>
    %cst = arith.constant dense<0.000000e+00> : vector<16x64xf32>
    %3 = tpu.matmul %1, %2, %cst {dimension_numbers = #tpu.dot_dimension_numbers<[1], [0], [0], [1], [0, 0, 1, 1], [], []>} : vector<16x32xbf16>, vector<32x64xbf16>, vector<16x64xf32> -> vector<16x64xf32>
    %c0_3 = arith.constant 0 : index
    %c0_4 = arith.constant 0 : index
    %4 = vector.load %arg3[%c0_3, %c0_4] : memref<1x64xf32, #tpu.memory_space<vmem>>, vector<1x64xf32>
    %5 = vector.broadcast %4 : vector<1x64xf32> to vector<16x64xf32>
    %6 = arith.addf %3, %5 : vector<16x64xf32>
    %cst_5 = arith.constant 0.000000e+00 : f32
    %7 = vector.broadcast %cst_5 : f32 to vector<16x64xf32>
    %8 = arith.maximumf %6, %7 : vector<16x64xf32>
    %9 = arith.truncf %8 : vector<16x64xf32> to vector<16x64xbf16>
    %c0_6 = arith.constant 0 : index
    %c0_7 = arith.constant 0 : index
    %10 = vector.load %arg4[%c0_6, %c0_7] : memref<64x32xbf16, #tpu.memory_space<vmem>>, vector<64x32xbf16>
    %cst_8 = arith.constant dense<0.000000e+00> : vector<16x32xf32>
    %11 = tpu.matmul %9, %10, %cst_8 {dimension_numbers = #tpu.dot_dimension_numbers<[1], [0], [0], [1], [0, 0, 1, 1], [], []>} : vector<16x64xbf16>, vector<64x32xbf16>, vector<16x32xf32> -> vector<16x32xf32>
    %c0_9 = arith.constant 0 : index
    %c0_10 = arith.constant 0 : index
    %12 = vector.load %arg5[%c0_9, %c0_10] : memref<1x32xf32, #tpu.memory_space<vmem>>, vector<1x32xf32>
    %13 = vector.broadcast %12 : vector<1x32xf32> to vector<16x32xf32>
    %14 = arith.addf %11, %13 : vector<16x32xf32>
    %15 = arith.addf %14, %0 : vector<16x32xf32>
    %cst_11 = arith.constant dense<0.000000e+00> : vector<16xf32>
    %16 = vector.multi_reduction <add>, %15, %cst_11 [1] : vector<16x32xf32> to vector<16xf32>
    %17 = vector.shape_cast %16 : vector<16xf32> to vector<16x1xf32>
    %cst_12 = arith.constant 3.200000e+01 : f32
    %18 = vector.broadcast %cst_12 : f32 to vector<16x1xf32>
    %19 = arith.divf %17, %18 : vector<16x1xf32>
    %20 = vector.broadcast %19 : vector<16x1xf32> to vector<16x32xf32>
    %21 = arith.subf %15, %20 : vector<16x32xf32>
    %22 = arith.mulf %21, %21 : vector<16x32xf32>
    %cst_13 = arith.constant dense<0.000000e+00> : vector<16xf32>
    %23 = vector.multi_reduction <add>, %22, %cst_13 [1] : vector<16x32xf32> to vector<16xf32>
    %24 = vector.shape_cast %23 : vector<16xf32> to vector<16x1xf32>
    %cst_14 = arith.constant 3.200000e+01 : f32
    %25 = vector.broadcast %cst_14 : f32 to vector<16x1xf32>
    %26 = arith.divf %24, %25 : vector<16x1xf32>
    %27 = vector.broadcast %19 : vector<16x1xf32> to vector<16x32xf32>
    %28 = arith.subf %15, %27 : vector<16x32xf32>
    %cst_15 = arith.constant 9.99999974E-6 : f32
    %29 = vector.broadcast %cst_15 : f32 to vector<16x1xf32>
    %30 = arith.addf %26, %29 : vector<16x1xf32>
    %31 = math.rsqrt %30 : vector<16x1xf32>
    %32 = vector.broadcast %31 : vector<16x1xf32> to vector<16x32xf32>
    %33 = arith.mulf %28, %32 : vector<16x32xf32>
    %c0_16 = arith.constant 0 : index
    %c0_17 = arith.constant 0 : index
    %34 = vector.load %arg6[%c0_16, %c0_17] : memref<1x32xf32, #tpu.memory_space<vmem>>, vector<1x32xf32>
    %35 = vector.broadcast %34 : vector<1x32xf32> to vector<16x32xf32>
    %36 = arith.mulf %33, %35 : vector<16x32xf32>
    %c0_18 = arith.constant 0 : index
    %c0_19 = arith.constant 0 : index
    %37 = vector.load %arg7[%c0_18, %c0_19] : memref<1x32xf32, #tpu.memory_space<vmem>>, vector<1x32xf32>
    %38 = vector.broadcast %37 : vector<1x32xf32> to vector<16x32xf32>
    %39 = arith.addf %36, %38 : vector<16x32xf32>
    %c0_20 = arith.constant 0 : index
    %c0_21 = arith.constant 0 : index
    %40 = vector.load %arg8[%c0_20, %c0_21] : memref<16x32xf32, #tpu.memory_space<vmem>>, vector<16x32xf32>
    tpu.vector_store %arg8[%c0_20, %c0_21], %39 {strides = array<i32>} : memref<16x32xf32, #tpu.memory_space<vmem>>, vector<16x32xf32>,
    return
  }
  func.func @transform_0(%arg0: i32) -> (i32, i32) {
    %c0_i32 = arith.constant 0 : i32
    %c0_i32_0 = arith.constant 0 : i32
    return %arg0, %c0_i32 : i32, i32
  }
  func.func @transform_1(%arg0: i32) -> (i32, i32) {
    %c0_i32 = arith.constant 0 : i32
    %c0_i32_0 = arith.constant 0 : i32
    %c0_i32_1 = arith.constant 0 : i32
    return %c0_i32, %c0_i32_0 : i32, i32
  }
  func.func @transform_2(%arg0: i32) -> (i32, i32) {
    %c0_i32 = arith.constant 0 : i32
    %c0_i32_0 = arith.constant 0 : i32
    %c0_i32_1 = arith.constant 0 : i32
    return %c0_i32, %c0_i32_0 : i32, i32
  }
  func.func @transform_3(%arg0: i32) -> (i32, i32) {
    %c0_i32 = arith.constant 0 : i32
    %c0_i32_0 = arith.constant 0 : i32
    %c0_i32_1 = arith.constant 0 : i32
    return %c0_i32, %c0_i32_0 : i32, i32
  }
  func.func @transform_4(%arg0: i32) -> (i32, i32) {
    %c0_i32 = arith.constant 0 : i32
    %c0_i32_0 = arith.constant 0 : i32
    %c0_i32_1 = arith.constant 0 : i32
    return %c0_i32, %c0_i32_0 : i32, i32
  }
  func.func @transform_5(%arg0: i32) -> (i32, i32) {
    %c0_i32 = arith.constant 0 : i32
    %c0_i32_0 = arith.constant 0 : i32
    %c0_i32_1 = arith.constant 0 : i32
    return %c0_i32, %c0_i32_0 : i32, i32
  }
  func.func @transform_6(%arg0: i32) -> (i32, i32) {
    %c0_i32 = arith.constant 0 : i32
    %c0_i32_0 = arith.constant 0 : i32
    %c0_i32_1 = arith.constant 0 : i32
    return %c0_i32, %c0_i32_0 : i32, i32
  }
  func.func @transform_7(%arg0: i32) -> (i32, i32) {
    %c0_i32 = arith.constant 0 : i32
    %c0_i32_0 = arith.constant 0 : i32
    return %arg0, %c0_i32 : i32, i32
  }
}

module attributes {stable_mosaic.version = 11 : i64} {
  func.func @_ffn_add_ln_kernel(%arg0: i32, %arg1: memref<16x32xf32, #tpu.memory_space<vmem>>, %arg2: memref<32x64xbf16, #tpu.memory_space<vmem>>, %arg3: memref<1x64xf32, #tpu.memory_space<vmem>>, %arg4: memref<64x32xbf16, #tpu.memory_space<vmem>>, %arg5: memref<1x32xf32, #tpu.memory_space<vmem>>, %arg6: memref<1x32xf32, #tpu.memory_space<vmem>>, %arg7: memref<1x32xf32, #tpu.memory_space<vmem>>, %arg8: memref<16x32xf32, #tpu.memory_space<vmem>>) attributes {dimension_semantics = [#tpu.dimension_semantics<parallel>], iteration_bounds = array<i64: 1>, scalar_prefetch = 0 : i64, scratch_operands = 0 : i64, tpu.core_type = #tpu.core_type<tc>, window_params = [{transform_indices = @transform_0, window_bounds = array<i64: 16, 32>}, {pipeline_mode = #tpu.pipeline_mode<synchronous>, transform_indices = @transform_1, window_bounds = array<i64: 32, 64>}, {pipeline_mode = #tpu.pipeline_mode<synchronous>, transform_indices = @transform_2, window_bounds = array<i64: 1, 64>}, {pipeline_mode = #tpu.pipeline_mode<synchronous>, transform_indices = @transform_3, window_bounds = array<i64: 64, 32>}, {pipeline_mode = #tpu.pipeline_mode<synchronous>, transform_indices = @transform_4, window_bounds = array<i64: 1, 32>}, {pipeline_mode = #tpu.pipeline_mode<synchronous>, transform_indices = @transform_5, window_bounds = array<i64: 1, 32>}, {pipeline_mode = #tpu.pipeline_mode<synchronous>, transform_indices = @transform_6, window_bounds = array<i64: 1, 32>}, {transform_indices = @transform_7, window_bounds = array<i64: 16, 32>}]} {
    %c0 = arith.constant 0 : index
    %c0_0 = arith.constant 0 : index
    %0 = vector.load %arg1[%c0, %c0_0] : memref<16x32xf32, #tpu.memory_space<vmem>>, vector<16x32xf32>
    %1 = arith.truncf %0 : vector<16x32xf32> to vector<16x32xbf16>
    %c0_1 = arith.constant 0 : index
    %c0_2 = arith.constant 0 : index
    %2 = vector.load %arg2[%c0_1, %c0_2] : memref<32x64xbf16, #tpu.memory_space<vmem>>, vector<32x64xbf16>
    %cst = arith.constant dense<0.000000e+00> : vector<16x64xf32>
    %3 = tpu.matmul %1, %2, %cst {dimension_numbers = #tpu.dot_dimension_numbers<[1], [0], [0], [1], [0, 0, 1, 1], [], []>} : vector<16x32xbf16>, vector<32x64xbf16>, vector<16x64xf32> -> vector<16x64xf32>
    %c0_3 = arith.constant 0 : index
    %c0_4 = arith.constant 0 : index
    %4 = vector.load %arg3[%c0_3, %c0_4] : memref<1x64xf32, #tpu.memory_space<vmem>>, vector<1x64xf32>
    %5 = vector.broadcast %4 : vector<1x64xf32> to vector<16x64xf32>
    %6 = arith.addf %3, %5 : vector<16x64xf32>
    %cst_5 = arith.constant 0.000000e+00 : f32
    %7 = vector.broadcast %cst_5 : f32 to vector<16x64xf32>
    %8 = arith.maximumf %6, %7 : vector<16x64xf32>
    %9 = arith.truncf %8 : vector<16x64xf32> to vector<16x64xbf16>
    %c0_6 = arith.constant 0 : index
    %c0_7 = arith.constant 0 : index
    %10 = vector.load %arg4[%c0_6, %c0_7] : memref<64x32xbf16, #tpu.memory_space<vmem>>, vector<64x32xbf16>
    %cst_8 = arith.constant dense<0.000000e+00> : vector<16x32xf32>
    %11 = tpu.matmul %9, %10, %cst_8 {dimension_numbers = #tpu.dot_dimension_numbers<[1], [0], [0], [1], [0, 0, 1, 1], [], []>} : vector<16x64xbf16>, vector<64x32xbf16>, vector<16x32xf32> -> vector<16x32xf32>
    %c0_9 = arith.constant 0 : index
    %c0_10 = arith.constant 0 : index
    %12 = vector.load %arg5[%c0_9, %c0_10] : memref<1x32xf32, #tpu.memory_space<vmem>>, vector<1x32xf32>
    %13 = vector.broadcast %12 : vector<1x32xf32> to vector<16x32xf32>
    %14 = arith.addf %11, %13 : vector<16x32xf32>
    %15 = arith.addf %14, %0 : vector<16x32xf32>
    %cst_11 = arith.constant dense<0.000000e+00> : vector<16xf32>
    %16 = vector.multi_reduction <add>, %15, %cst_11 [1] : vector<16x32xf32> to vector<16xf32>
    %17 = vector.shape_cast %16 : vector<16xf32> to vector<16x1xf32>
    %cst_12 = arith.constant 3.200000e+01 : f32
    %18 = vector.broadcast %cst_12 : f32 to vector<16x1xf32>
    %19 = arith.divf %17, %18 : vector<16x1xf32>
    %20 = vector.broadcast %19 : vector<16x1xf32> to vector<16x32xf32>
    %21 = arith.subf %15, %20 : vector<16x32xf32>
    %22 = arith.mulf %21, %21 : vector<16x32xf32>
    %cst_13 = arith.constant dense<0.000000e+00> : vector<16xf32>
    %23 = vector.multi_reduction <add>, %22, %cst_13 [1] : vector<16x32xf32> to vector<16xf32>
    %24 = vector.shape_cast %23 : vector<16xf32> to vector<16x1xf32>
    %cst_14 = arith.constant 3.200000e+01 : f32
    %25 = vector.broadcast %cst_14 : f32 to vector<16x1xf32>
    %26 = arith.divf %24, %25 : vector<16x1xf32>
    %27 = vector.broadcast %19 : vector<16x1xf32> to vector<16x32xf32>
    %28 = arith.subf %15, %27 : vector<16x32xf32>
    %cst_15 = arith.constant 9.99999974E-6 : f32
    %29 = vector.broadcast %cst_15 : f32 to vector<16x1xf32>
    %30 = arith.addf %26, %29 : vector<16x1xf32>
    %31 = math.rsqrt %30 : vector<16x1xf32>
    %32 = vector.broadcast %31 : vector<16x1xf32> to vector<16x32xf32>
    %33 = arith.mulf %28, %32 : vector<16x32xf32>
    %c0_16 = arith.constant 0 : index
    %c0_17 = arith.constant 0 : index
    %34 = vector.load %arg6[%c0_16, %c0_17] : memref<1x32xf32, #tpu.memory_space<vmem>>, vector<1x32xf32>
    %35 = vector.broadcast %34 : vector<1x32xf32> to vector<16x32xf32>
    %36 = arith.mulf %33, %35 : vector<16x32xf32>
    %c0_18 = arith.constant 0 : index
    %c0_19 = arith.constant 0 : index
    %37 = vector.load %arg7[%c0_18, %c0_19] : memref<1x32xf32, #tpu.memory_space<vmem>>, vector<1x32xf32>
    %38 = vector.broadcast %37 : vector<1x32xf32> to vector<16x32xf32>
    %39 = arith.addf %36, %38 : vector<16x32xf32>
    %c0_20 = arith.constant 0 : index
    %c0_21 = arith.constant 0 : index
    %40 = vector.load %arg8[%c0_20, %c0_21] : memref<16x32xf32, #tpu.memory_space<vmem>>, vector<16x32xf32>
    tpu.vector_store %arg8[%c0_20, %c0_21], %39 {strides = array<i32>} : memref<16x32xf32, #tpu.memory_space<vmem>>, vector<16x32xf32>,
    return
  }
  func.func @transform_0(%arg0: i32) -> (i32, i32) {
    %c0_i32 = arith.constant 0 : i32
    %c0_i32_0 = arith.constant 0 : i32
    return %arg0, %c0_i32 : i32, i32
  }
  func.func @transform_1(%arg0: i32) -> (i32, i32) {
    %c0_i32 = arith.constant 0 : i32
    %c0_i32_0 = arith.constant 0 : i32
    %c0_i32_1 = arith.constant 0 : i32
    return %c0_i32, %c0_i32_0 : i32, i32
  }
  func.func @transform_2(%arg0: i32) -> (i32, i32) {
    %c0_i32 = arith.constant 0 : i32
    %c0_i32_0 = arith.constant 0 : i32
    %c0_i32_1 = arith.constant 0 : i32
    return %c0_i32, %c0_i32_0 : i32, i32
  }
  func.func @transform_3(%arg0: i32) -> (i32, i32) {
    %c0_i32 = arith.constant 0 : i32
    %c0_i32_0 = arith.constant 0 : i32
    %c0_i32_1 = arith.constant 0 : i32
    return %c0_i32, %c0_i32_0 : i32, i32
  }
  func.func @transform_4(%arg0: i32) -> (i32, i32) {
    %c0_i32 = arith.constant 0 : i32
    %c0_i32_0 = arith.constant 0 : i32
    %c0_i32_1 = arith.constant 0 : i32
    return %c0_i32, %c0_i32_0 : i32, i32
  }
  func.func @transform_5(%arg0: i32) -> (i32, i32) {
    %c0_i32 = arith.constant 0 : i32
    %c0_i32_0 = arith.constant 0 : i32
    %c0_i32_1 = arith.constant 0 : i32
    return %c0_i32, %c0_i32_0 : i32, i32
  }
  func.func @transform_6(%arg0: i32) -> (i32, i32) {
    %c0_i32 = arith.constant 0 : i32
    %c0_i32_0 = arith.constant 0 : i32
    %c0_i32_1 = arith.constant 0 : i32
    return %c0_i32, %c0_i32_0 : i32, i32
  }
  func.func @transform_7(%arg0: i32) -> (i32, i32) {
    %c0_i32 = arith.constant 0 : i32
    %c0_i32_0 = arith.constant 0 : i32
    return %arg0, %c0_i32 : i32, i32
  }
}

</mosaic_0001>

<bundles_post_ra>
// kernel: decoder_forward.16
= control target key start
LH: loop header
LB: loop body
LE: loop exit
PB: predicated region body
PF: predicated region fallthrough
CT: control target
= control target key end

     0   :  { %vm19_vm0 = vcmask 785408   ;;  %v132_v0 = vmov 0.0   ;;  %vm133_vm1 = vmmov 0   ;;  %vm43_vm2 = vcmask 261120   ;;  %s181_s1 = inlined_call_operand.vmem [shape: bf16[32,96], index: 1, kind: input, shape index: {}]   ;;  %s182_s0 = inlined_call_operand.vmem [shape: f32[16,32], index: 0, kind: input, shape index: {}]   ;;  %s183_s2 = inlined_call_operand.vmem [shape: f32[1,96], index: 2, kind: input, shape index: {}]   ;;  %s184_s3 = inlined_call_operand.vmem [shape: f32[16,96], index: 3, kind: output, shape index: {}]  }
   0x1   :  { %120 = vmatprep.subr.bf16.mxu0 %v132_v0  ;;  %v130_v1 = vld [vmem:[%s181_s1 + $0x8] sm:$0xff]   ;;  %124 = vmatprep.mubr.msk.bf16.mxu0 %vm133_vm1, %v132_v0  ;;  %20 = vst.msk [vmem:[#allocation2] sm:$0xff] %vm19_vm0, %v132_v0  ;;  %21 = vst.msk [vmem:[#allocation2 + $0x8] sm:$0xff] %vm19_vm0, %v132_v0  ;;  %v131_v2 = vld [vmem:[%s181_s1] sm:$0xff]  }
   0x2   :  { %121 = vmatpush3.bf16.msra.mxu0 %v130_v1  ;;  %v24_v3 = vld [vmem:[%s182_s0] sm:$0xff]  ;;  %v25_v4 = vld [vmem:[%s182_s0 + $0x8] sm:$0xff] }
   0x3   :  { %122 = vmatprep.subr.bf16.mxu0 %v132_v0  ;;  %v26_v5 = vpack.c.bf16 %v25_v4, %v24_v3  ;;  %v116_v14 = vld [vmem:[%s183_s2] ss:$0 sm:$0xff] }
   0x6   :  { %123 = vmatpush3.bf16.msra.mxu0 %v131_v2 }
   0x8   :  { %v22_v6 = vld [vmem:[#allocation2] sm:$0xff]  ;;  %v23_v10 = vld [vmem:[#allocation2 + $0x8] sm:$0xff] }
   0x9   :  { %125 = vmatmul.mubr.msk.bf16.vlgmr.msra.gmra.mxu0 %vm43_vm2, %v26_v5 }
  0xc9   :  { %v81_v7 = vpop.f32.mrf.mxu0 }
  0xca   :  { %v88_v8 = vadd.f32 %v81_v7, %v22_v6 }
  0xcb   :  { %v126_v9 = vpop.f32.mrf.mxu0 }
  0xcc   :  { %91 = vst.msk [vmem:[#allocation2] sm:$0xff] %vm19_vm0, %v88_v8 }
  0xcd   :  { %v84_v11 = vpop.f32.mrf.mxu0 }
  0xce   :  { %v89_v12 = vadd.f32 %v84_v11, %v23_v10 }
  0xcf   :  { %v127_v13 = vpop.f32.mrf.mxu0 }
  0xd0   :  { %92 = vst.msk [vmem:[#allocation2 + $0x8] sm:$0xff] %vm19_vm0, %v89_v12 }
  0xd3   :  { %v96_v15 = vld [vmem:[#allocation2] sm:$0xff] }
  0xd4   :  { %v105_v16 = vadd.f32 %v116_v14, %v96_v15 }
  0xd6   :  { %107 = vst.msk [vmem:[%s184_s3] sm:$0xff] %vm19_vm0, %v105_v16 }
  0xd7   :  { %v97_v17 = vld [vmem:[#allocation2 + $0x8] sm:$0xff] }
  0xd8   :  { %v106_v18 = vadd.f32 %v116_v14, %v97_v17 }
  0xda   :  { %108 = vst.msk [vmem:[%s184_s3 + $0x8] sm:$0xff] %vm19_vm0, %v106_v18 }

// kernel: decoder_forward.17
= control target key start
LH: loop header
LB: loop body
LE: loop exit
PB: predicated region body
PF: predicated region fallthrough
CT: control target
= control target key end

     0   :  { %s824_s9 = smov 0   ;;  %s928_s0 = inlined_call_operand.vmem [shape: f32[16,96], index: 0, kind: input, shape index: {}]   ;;  %s929_s1 = inlined_call_operand.vmem [shape: f32[8,8], index: 1, kind: input, shape index: {}]   ;;  %s930_s2 = inlined_call_operand.vmem [shape: f32[16,32], index: 2, kind: output, shape index: {}]  }
   0x1 LB: > { %s664_s10 = sadd.s32 4294967295, %s791_s9   ;;  %p668_p0 = scmp.ge.s32.totalorder %s791_s9, 1  ;;  %s791_s9 = sphi %s824_s9, %s12_s9  }
   0x2   : > { %p111_p1 = scmp.lt.s32.totalorder %s791_s9, 3 }
   0x4   : > { %p112_p2 = pnand %p668_p0, %p111_p1 }
   0x5   : > { %p131_p3 = scmp.lt.s32.totalorder (!%p112_p2), %s664_s10, 1  ;;  %s795_s15 = smov (!%p112_p2), 96  }
   0x6   : > { %115 = sbr.rel (%p112_p2) target bundleno = 1233 (0x4d1), region = 28  ;;  %s796_s16 = smov (!%p112_p2), 64  }
   0x7   : > { %s797_s17 = smov (!%p112_p2), 88   ;;  %s798_s18 = smov (!%p112_p2), 120  }
   0x8   : > { %s799_s19 = smov (!%p112_p2), 80   ;;  %s800_s20 = smov (!%p112_p2), 112  }
   0x9   : > { %s801_s21 = smov (!%p112_p2), 72   ;;  %s802_s22 = smov (!%p112_p2), 104  }
   0xa   : > { %s803_s25 = smov (!%p112_p2), 48   ;;  %s804_s26 = smov (!%p112_p2), 56  }
   0xb   : > { %v793_v0 = vmov 0.0   ;;  %vm794_vm0 = vmmov 0   ;;  %s932_s10 = smov (!%p131_p3, %s664_s10), 1  ;;  %vm146_vm1 = vcmask 64512   ;;  %v865_v6 = vld [vmem:[%s929_s1] sm:$0xff]  ;;  %vm210_vm2 = vcmask 1043456  }
   0xc   : > { %697 = vmatprep.subr.bf16.mxu0 %v793_v0  ;;  %699 = vmatprep.mubr.msk.bf16.mxu0 %vm794_vm0, %v793_v0  ;;  %s669_s11 = sshll.u32 %s932_s10, 3  ;;  %s805_s27 = smov 40   ;;  %vm605_vm3 = vcmask 130048   ;;  %vm607_vm4 = vcmask 195584   ;;  %vm609_vm5 = vcmask 261120  }
   0xd   : > { %703 = vmatprep.subr.bf16.mxu1 %v793_v0  ;;  %705 = vmatprep.mubr.msk.bf16.mxu1 %vm794_vm0, %v793_v0  ;;  %s134_s14 = scalar_lea.vmem %s928_s0, %s669_s11  ;;  %s806_s28 = smov 8  }
   0xe   : > { %v141_v1 = vld [vmem:[%s134_s14] sm:$0xff]  ;;  %s807_s29 = smov 16   ;;  %s808_s30 = smov 24  }
   0xf   : > { %v846_v2 = vpack.c.bf16 %v141_v1, %v141_v1  ;;  %s138_s5 = scalar_lea.vmem %s930_s2, %s669_s11 }
  0x11   : > { %144 = vrot.lane.b32.xlu0 %v846_v2, %s795_s15  ;;  %205 = vrot.lane.b32.xlu1 %v846_v2, %s796_s16 }
  0x15   : > { %258 = vrot.lane.b32.xlu1 %v846_v2, %s797_s17 }
  0x19   : > { %256 = vrot.lane.b32.xlu1 %v846_v2, %s798_s18 }
  0x1d   : > { %370 = vrot.lane.b32.xlu1 %v846_v2, %s799_s19 }
  0x21   : > { %368 = vrot.lane.b32.xlu1 %v846_v2, %s800_s20 }
  0x25   : > { %482 = vrot.lane.b32.xlu1 %v846_v2, %s801_s21 }
  0x29   : > { %480 = vrot.lane.b32.xlu1 %v846_v2, %s802_s22 }
  0x83   : > { %v145_v3 = vpop.permute.xlu0 %144  ;;  %v206_v13 = vpop.permute.xlu1 %205 }
  0x84   : > { %v151_v4 = vsel %vm146_vm1, %v145_v3, 0  ;;  %v212_v14 = vsel %vm210_vm2, %v206_v13, 0 }
  0x85   : > { %698 = vmatpush3.bf16.xpose.msra.mxu0 %v151_v4  ;;  %704 = vmatpush3.bf16.msra.mxu1 %v212_v14 }
  0x86   : > { %715 = vmatprep.subr.bf16.mxu0 %v793_v0  ;;  %709 = vmatprep.subr.bf16.mxu1 %v793_v0 }
  0x87   : > { %v259_v18 = vpop.permute.xlu1 %258 }
  0x88   : > { %v264_v21 = vsel %vm146_vm1, %v259_v18, 0 }
  0x8b   : > { %v257_v20 = vpop.permute.xlu1 %256 }
  0x8c   : > { %700 = vmatmul.mubr.msk.bf16.vlgmr.msra.gmra.mxu0 %vm146_vm1, %v846_v2 }
  0x8d   : > { %717 = vmatprep.mubr.msk.bf16.mxu0 %vm794_vm0, %v793_v0 }
  0x8f   : > { %v371_v23 = vpop.permute.xlu1 %370 }
  0x90   : > { %v376_v24 = vsel %vm146_vm1, %v371_v23, 0 }
  0x93   : > { %v369_v25 = vpop.permute.xlu1 %368 }
  0x97   : > { %v483_v26 = vpop.permute.xlu1 %482 }
  0x98   : > { %v488_v27 = vsel %vm146_vm1, %v483_v26, 0 }
  0x9b   : > { %v481_v28 = vpop.permute.xlu1 %480 }
 0x14c   : > { %v187_v5 = vpop.f32.mrf.mxu0 }
 0x14d   : > { %v193_v7 = vmul.f32 0.35355338, %v187_v5 }
 0x14e   : > { %v701_v8 = vpop.f32.mrf.mxu0 }
 0x14f   : > { %v194_v9 = vadd.f32 %v193_v7, %v865_v6 }
 0x150   : > { %v190_v10 = vpop.f32.mrf.mxu0 }
 0x151   : > { %v195_v11 = vsel %vm146_vm1, %v194_v9, -inf }
 0x152   : > { %196 = vmax.xlane.f32.xlu0 %v195_v11  ;;  %v702_v12 = vpop.f32.mrf.mxu0 }
 0x1db   : > { %v197_v15 = vpop.xlane.xlu0 %196 }
 0x1dc   : > { %v198_v16 = vsub.f32 %v194_v9, %v197_v15 }
 0x1de   : > { %v199_v17 = vmul.f32 1.442695, %v198_v16 }
 0x1e0   : > { %769 = vpow2.f32 %v199_v17 }
 0x1ed   : > { %v871_v19 = vpop.eup %769 }
 0x1ee   : > { %v204_v22 = vpack.c.bf16 %v871_v19, %v871_v19  ;;  %v201_v15 = vsel %vm146_vm1, %v871_v19, 0.0 }
 0x1f0   : > { %706 = vmatmul.mubr.msk.bf16.vlgmr.msra.gmra.mxu1 %vm146_vm1, %v204_v22 }
 0x1f1   : > { %710 = vmatpush3.bf16.xpose.msra.mxu1 %v264_v21  ;;  %711 = vmatprep.mubr.msk.bf16.mxu1 %vm794_vm0, %v793_v0 }
 0x1f2   : > { %721 = vmatprep.subr.bf16.mxu1 %v793_v0 }
 0x1f8   : > { %712 = vmatmul.mubr.msk.bf16.vlgmr.msra.gmra.mxu1 %vm146_vm1, %v257_v20 }
 0x1f9   : > { %722 = vmatpush3.bf16.xpose.msra.mxu1 %v376_v24  ;;  %723 = vmatprep.mubr.msk.bf16.mxu1 %vm794_vm0, %v793_v0 }
 0x1fa   : > { %733 = vmatprep.subr.bf16.mxu1 %v793_v0 }
 0x200   : > { %724 = vmatmul.mubr.msk.bf16.vlgmr.msra.gmra.mxu1 %vm146_vm1, %v369_v25 }
 0x201   : > { %734 = vmatpush3.bf16.xpose.msra.mxu1 %v488_v27  ;;  %735 = vmatprep.mubr.msk.bf16.mxu1 %vm794_vm0, %v793_v0 }
 0x208   : > { %736 = vmatmul.mubr.msk.bf16.vlgmr.msra.gmra.mxu1 %vm146_vm1, %v481_v28 }
 0x2b0   : > { %v890_v29 = vpop.f32.mrf.mxu1 }
 0x2b2   : > { %v707_v30 = vpop.f32.mrf.mxu1 }
 0x2b4   : > { %v251_v31 = vpop.f32.mrf.mxu1 }
 0x2b6   : > { %v708_v32 = vpop.f32.mrf.mxu1 }
 0x2b8   : > { %v300_v33 = vpop.f32.mrf.mxu1 }
 0x2b9   : > { %v306_v34 = vmul.f32 0.35355338, %v300_v33 }
 0x2ba   : > { %v713_v35 = vpop.f32.mrf.mxu1 }
 0x2bb   : > { %v307_v36 = vadd.f32 %v306_v34, %v865_v6 }
 0x2bc   : > { %v303_v37 = vpop.f32.mrf.mxu1 }
 0x2bd   : > { %v308_v38 = vsel %vm146_vm1, %v307_v36, -inf }
 0x2be   : > { %309 = vmax.xlane.f32.xlu1 %v308_v38  ;;  %v714_v39 = vpop.f32.mrf.mxu1 }
 0x2c0   : > { %v412_v40 = vpop.f32.mrf.mxu1 }
 0x2c1   : > { %v418_v41 = vmul.f32 0.35355338, %v412_v40 }
 0x2c2   : > { %v725_v42 = vpop.f32.mrf.mxu1 }
 0x2c3   : > { %v419_v43 = vadd.f32 %v418_v41, %v865_v6 }
 0x2c4   : > { %v415_v44 = vpop.f32.mrf.mxu1 }
 0x2c5   : > { %v420_v45 = vsel %vm146_vm1, %v419_v43, -inf }
 0x2c6   : > { %421 = vmax.xlane.f32.xlu0 %v420_v45  ;;  %v726_v46 = vpop.f32.mrf.mxu1 }
 0x2c8   : > { %v524_v47 = vpop.f32.mrf.mxu1 }
 0x2c9   : > { %v530_v51 = vmul.f32 0.35355338, %v524_v47 }
 0x2ca   : > { %v737_v48 = vpop.f32.mrf.mxu1 }
 0x2cb   : > { %v531_v52 = vadd.f32 %v530_v51, %v865_v6 }
 0x2cc   : > { %v527_v49 = vpop.f32.mrf.mxu1 }
 0x2cd   : > { %v532_v53 = vsel %vm146_vm1, %v531_v52, -inf }
 0x2ce   : > { %v738_v50 = vpop.f32.mrf.mxu1 }
 0x2cf   : > { %430 = vrot.lane.b32.xlu1 %v846_v2, %s803_s25 }
 0x2dc   : > { %318 = vrot.lane.b32.xlu0 %v846_v2, %s804_s26 }
 0x2fb   : > { %533 = vmax.xlane.f32.xlu0 %v532_v53 }
 0x311   : > { %542 = vrot.lane.b32.xlu0 %v846_v2, %s805_s27 }
 0x347   : > { %v310_v54 = vpop.xlane.xlu1 %309 }
 0x348   : > { %v311_v55 = vsub.f32 %v307_v36, %v310_v54 }
 0x34a   : > { %v312_v56 = vmul.f32 1.442695, %v311_v55 }
 0x34b   : > { %v431_v62 = vpop.permute.xlu1 %430 }
 0x34c   : > { %771 = vpow2.f32 %v312_v56  ;;  %v436_v2 = vsel %vm210_vm2, %v431_v62, 0 }
 0x34f   : > { %v422_v57 = vpop.xlane.xlu0 %421 }
 0x350   : > { %v423_v58 = vsub.f32 %v419_v43, %v422_v57 }
 0x352   : > { %v424_v59 = vmul.f32 1.442695, %v423_v58 }
 0x353   : > { %v319_v60 = vpop.permute.xlu0 %318 }
 0x354   : > { %773 = vpow2.f32 %v424_v59  ;;  %v324_v61 = vsel %vm210_vm2, %v319_v60, 0 }
 0x355   : > { %716 = vmatpush3.bf16.msra.mxu0 %v324_v61 }
 0x356   : > { %727 = vmatprep.subr.bf16.mxu0 %v793_v0 }
 0x359   : > { %v772_v63 = vpop.eup %771 }
 0x35a   : > { %v314_v1 = vsel %vm146_vm1, %v772_v63, 0.0  ;;  %v317_v3 = vpack.c.bf16 %v772_v63, %v772_v63 }
 0x35b   : > { %315 = vadd.xlane.f32.xlu0 %v314_v1 }
 0x35c   : > { %718 = vmatmul.mubr.msk.bf16.vlgmr.msra.gmra.mxu0 %vm146_vm1, %v317_v3 }
 0x35d   : > { %728 = vmatpush3.bf16.msra.mxu0 %v436_v2  ;;  %729 = vmatprep.mubr.msk.bf16.mxu0 %vm794_vm0, %v793_v0 }
 0x35e   : > { %739 = vmatprep.subr.bf16.mxu0 %v793_v0 }
 0x361   : > { %v774_v4 = vpop.eup %773 }
 0x362   : > { %v426_v5 = vsel %vm146_vm1, %v774_v4, 0.0  ;;  %v429_v6 = vpack.c.bf16 %v774_v4, %v774_v4 }
 0x363   : > { %427 = vadd.xlane.f32.xlu1 %v426_v5 }
 0x364   : > { %730 = vmatmul.mubr.msk.bf16.vlgmr.msra.gmra.mxu0 %vm146_vm1, %v429_v6 }
 0x365   : > { %741 = vmatprep.mubr.msk.bf16.mxu0 %vm794_vm0, %v793_v0 }
 0x384   : > { %v534_v7 = vpop.xlane.xlu0 %533 }
 0x385   : > { %v535_v8 = vsub.f32 %v531_v52, %v534_v7 }
 0x387   : > { %v536_v9 = vmul.f32 1.442695, %v535_v8 }
 0x388   : > { %v543_v10 = vpop.permute.xlu0 %542 }
 0x389   : > { %775 = vpow2.f32 %v536_v9  ;;  %v548_v11 = vsel %vm210_vm2, %v543_v10, 0 }
 0x38a   : > { %740 = vmatpush3.bf16.msra.mxu0 %v548_v11 }
 0x396   : > { %v776_v12 = vpop.eup %775 }
 0x397   : > { %v538_v13 = vsel %vm146_vm1, %v776_v12, 0.0  ;;  %v541_v14 = vpack.c.bf16 %v776_v12, %v776_v12 }
 0x398   : > { %539 = vadd.xlane.f32.xlu0 %v538_v13 }
 0x399   : > { %742 = vmatmul.mubr.msk.bf16.vlgmr.msra.gmra.mxu0 %vm146_vm1, %v541_v14 }
 0x39c   : > { %202 = vadd.xlane.f32.xlu0 %v201_v15 }
 0x3e4   : > { %v316_v0 = vpop.xlane.xlu0 %315 }
 0x3e5   : > { %777 = vrcp.f32 %v316_v0 }
 0x3ec   : > { %v428_v16 = vpop.xlane.xlu1 %427 }
 0x3ed   : > { %779 = vrcp.f32 %v428_v16 }
 0x3f2   : > { %v778_v17 = vpop.eup %777 }
 0x3fa   : > { %v780_v24 = vpop.eup %779 }
 0x41c   : > { %v360_v18 = vpop.f32.mrf.mxu0 }
 0x41d   : > { %v367_v20 = vmul.f32 %v778_v17, %v360_v18 }
 0x41e   : > { %v719_v21 = vpop.f32.mrf.mxu0 }
 0x41f   : > { %593 = vrot.lane.b32.xlu0 %v367_v20, %s806_s28 }
 0x420   : > { %v363_v22 = vpop.f32.mrf.mxu0 }
 0x421   : > { %v540_v30 = vpop.xlane.xlu0 %539 }
 0x422   : > { %v720_v23 = vpop.f32.mrf.mxu0  ;;  %781 = vrcp.f32 %v540_v30 }
 0x424   : > { %v472_v25 = vpop.f32.mrf.mxu0 }
 0x425   : > { %v479_v26 = vmul.f32 %v780_v24, %v472_v25  ;;  %v203_v37 = vpop.xlane.xlu0 %202 }
 0x426   : > { %v731_v27 = vpop.f32.mrf.mxu0  ;;  %783 = vrcp.f32 %v203_v37 }
 0x427   : > { %597 = vrot.lane.b32.xlu1 %v479_v26, %s807_s29 }
 0x428   : > { %v475_v19 = vpop.f32.mrf.mxu0 }
 0x42a   : > { %v732_v28 = vpop.f32.mrf.mxu0 }
 0x42f   : > { %v782_v31 = vpop.eup %781 }
 0x433   : > { %v784_v38 = vpop.eup %783 }
 0x434   : > { %v255_v40 = vmul.f32 %v784_v38, %v890_v29 }
 0x459   : > { %v584_v32 = vpop.f32.mrf.mxu0 }
 0x45a   : > { %v591_v33 = vmul.f32 %v782_v31, %v584_v32 }
 0x45b   : > { %v743_v34 = vpop.f32.mrf.mxu0 }
 0x45c   : > { %601 = vrot.lane.b32.xlu0 %v591_v33, %s808_s30 }
 0x45d   : > { %v587_v35 = vpop.f32.mrf.mxu0 }
 0x45f   : > { %v744_v36 = vpop.f32.mrf.mxu0 }
 0x491   : > { %v594_v39 = vpop.permute.xlu0 %593 }
 0x492   : > { %v604_v42 = vsel %vm146_vm1, %v255_v40, %v594_v39 }
 0x499   : > { %v598_v41 = vpop.permute.xlu1 %597 }
 0x49a   : > { %v606_v43 = vsel %vm605_vm3, %v604_v42, %v598_v41 }
 0x4ce   : > { %v602_v44 = vpop.permute.xlu0 %601 }
 0x4cf   : > { %v608_v45 = vsel %vm607_vm4, %v606_v43, %v602_v44 }
 0x4d0   : > { %610 = vst.msk [vmem:[%s138_s5] sm:$0xff] %vm609_vm5, %v608_v45 }
 0x4d1 PF: > { %s12_s9 = sadd.s32 1, %s791_s9  }
 0x4d2   : > { %p9_p4 = scmp.ge.s32.totalorder %s12_s9, 4  }
 0x4d4   :  { %11 = sbr.rel (!%p9_p4) target bundleno = 1 (0x1), region = 58 }

// kernel: decoder_forward.19
= control target key start
LH: loop header
LB: loop body
LE: loop exit
PB: predicated region body
PF: predicated region fallthrough
CT: control target
= control target key end

     0   :  { %vm19_vm0 = vcmask 261120   ;;  %v131_v0 = vmov 0.0   ;;  %vm132_vm1 = vmmov 0   ;;  %s181_s1 = inlined_call_operand.vmem [shape: bf16[32,32], index: 1, kind: input, shape index: {}]   ;;  %s182_s0 = inlined_call_operand.vmem [shape: f32[16,32], index: 0, kind: input, shape index: {}]   ;;  %s183_s2 = inlined_call_operand.vmem [shape: f32[1,32], index: 2, kind: input, shape index: {}]   ;;  %s184_s3 = inlined_call_operand.vmem [shape: f32[16,32], index: 3, kind: output, shape index: {}]  }
   0x1   :  { %119 = vmatprep.subr.bf16.mxu0 %v131_v0  ;;  %v129_v1 = vld [vmem:[%s181_s1 + $0x8] sm:$0xff]   ;;  %123 = vmatprep.mubr.msk.bf16.mxu0 %vm132_vm1, %v131_v0  ;;  %20 = vst.msk [vmem:[#allocation2] sm:$0xff] %vm19_vm0, %v131_v0  ;;  %21 = vst.msk [vmem:[#allocation2 + $0x8] sm:$0xff] %vm19_vm0, %v131_v0  ;;  %v130_v2 = vld [vmem:[%s181_s1] sm:$0xff]  }
   0x2   :  { %120 = vmatpush3.bf16.msra.mxu0 %v129_v1  ;;  %v24_v3 = vld [vmem:[%s182_s0] sm:$0xff]  ;;  %v25_v4 = vld [vmem:[%s182_s0 + $0x8] sm:$0xff] }
   0x3   :  { %121 = vmatprep.subr.bf16.mxu0 %v131_v0  ;;  %v26_v5 = vpack.c.bf16 %v25_v4, %v24_v3  ;;  %v115_v14 = vld [vmem:[%s183_s2] ss:$0 sm:$0xff] }
   0x6   :  { %122 = vmatpush3.bf16.msra.mxu0 %v130_v2 }
   0x8   :  { %v22_v6 = vld [vmem:[#allocation2] sm:$0xff]  ;;  %v23_v10 = vld [vmem:[#allocation2 + $0x8] sm:$0xff] }
   0x9   :  { %124 = vmatmul.mubr.msk.bf16.vlgmr.msra.gmra.mxu0 %vm19_vm0, %v26_v5 }
  0xc9   :  { %v81_v7 = vpop.f32.mrf.mxu0 }
  0xca   :  { %v88_v8 = vadd.f32 %v81_v7, %v22_v6 }
  0xcb   :  { %v125_v9 = vpop.f32.mrf.mxu0 }
  0xcc   :  { %90 = vst.msk [vmem:[#allocation2] sm:$0xff] %vm19_vm0, %v88_v8 }
  0xcd   :  { %v84_v11 = vpop.f32.mrf.mxu0 }
  0xce   :  { %v89_v12 = vadd.f32 %v84_v11, %v23_v10 }
  0xcf   :  { %v126_v13 = vpop.f32.mrf.mxu0 }
  0xd0   :  { %91 = vst.msk [vmem:[#allocation2 + $0x8] sm:$0xff] %vm19_vm0, %v89_v12 }
  0xd3   :  { %v95_v15 = vld [vmem:[#allocation2] sm:$0xff] }
  0xd4   :  { %v104_v16 = vadd.f32 %v115_v14, %v95_v15 }
  0xd6   :  { %106 = vst.msk [vmem:[%s184_s3] sm:$0xff] %vm19_vm0, %v104_v16 }
  0xd7   :  { %v96_v17 = vld [vmem:[#allocation2 + $0x8] sm:$0xff] }
  0xd8   :  { %v105_v18 = vadd.f32 %v115_v14, %v96_v17 }
  0xda   :  { %107 = vst.msk [vmem:[%s184_s3 + $0x8] sm:$0xff] %vm19_vm0, %v105_v18 }

// kernel: decoder_forward.18
= control target key start
LH: loop header
LB: loop body
LE: loop exit
PB: predicated region body
PF: predicated region fallthrough
CT: control target
= control target key end

     0   :  { %v175_v0 = vmov 0.0   ;;  %vm176_vm0 = vmmov 0   ;;  %vm50_vm1 = vcmask 261120   ;;  %s252_s1 = inlined_call_operand.vmem [shape: bf16[32,32], index: 1, kind: input, shape index: {}]   ;;  %s253_s0 = inlined_call_operand.vmem [shape: f32[16,32], index: 0, kind: input, shape index: {}]   ;;  %s254_s2 = inlined_call_operand.vmem [shape: f32[1,32], index: 2, kind: input, shape index: {}]   ;;  %s255_s3 = inlined_call_operand.vmem [shape: f32[16,32], index: 3, kind: input, shape index: {}]   ;;  %s256_s4 = inlined_call_operand.vmem [shape: f32[1,32], index: 4, kind: input, shape index: {}]   ;;  %s257_s5 = inlined_call_operand.vmem [shape: f32[1,32], index: 5, kind: input, shape index: {}]   ;;  %s258_s6 = inlined_call_operand.vmem [shape: f32[16,32], index: 6, kind: output, shape index: {}]  }
   0x1   :  { %159 = vmatprep.subr.bf16.mxu0 %v175_v0  ;;  %v169_v1 = vld [vmem:[%s252_s1 + $0x8] sm:$0xff]   ;;  %163 = vmatprep.mubr.msk.bf16.mxu0 %vm176_vm0, %v175_v0  ;;  %v170_v2 = vld [vmem:[%s252_s1] sm:$0xff]  }
   0x2   :  { %160 = vmatpush3.bf16.msra.mxu0 %v169_v1  ;;  %v24_v3 = vld [vmem:[%s253_s0] sm:$0xff]  ;;  %v25_v4 = vld [vmem:[%s253_s0 + $0x8] sm:$0xff] }
   0x3   :  { %161 = vmatprep.subr.bf16.mxu0 %v175_v0  ;;  %v26_v5 = vpack.c.bf16 %v25_v4, %v24_v3  ;;  %v150_v6 = vld [vmem:[%s254_s2] ss:$0 sm:$0xff]  ;;  %v96_v13 = vld [vmem:[%s255_s3 + $0x8] sm:$0xff] }
   0x4   :  { %v95_v8 = vld [vmem:[%s255_s3] sm:$0xff] }
   0x5   :  { %v154_v36 = vld [vmem:[%s256_s4] ss:$0 sm:$0xff] }
   0x6   :  { %162 = vmatpush3.bf16.msra.mxu0 %v170_v2  ;;  %v155_v38 = vld [vmem:[%s257_s5] ss:$0 sm:$0xff] }
   0x9   :  { %164 = vmatmul.mubr.msk.bf16.vlgmr.msra.gmra.mxu0 %vm50_vm1, %v26_v5 }
  0xc9   :  { %v88_v7 = vpop.f32.mrf.mxu0 }
  0xca   :  { %v89_v9 = vadd.f32 %v150_v6, %v88_v7 }
  0xcb   :  { %v165_v10 = vpop.f32.mrf.mxu0 }
  0xcc   :  { %v97_v11 = vadd.f32 %v95_v8, %v89_v9 }
  0xcd   :  { %v91_v12 = vpop.f32.mrf.mxu0 }
  0xce   :  { %v92_v14 = vadd.f32 %v150_v6, %v91_v12  ;;  %v99_v15 = vsel %vm50_vm1, %v97_v11, 0.0 }
  0xcf   :  { %100 = vadd.xlane.f32.xlu0 %v99_v15  ;;  %v166_v16 = vpop.f32.mrf.mxu0 }
  0xd0   :  { %v98_v17 = vadd.f32 %v96_v13, %v92_v14 }
  0xd2   :  { %v102_v18 = vsel %vm50_vm1, %v98_v17, 0.0 }
  0xd3   :  { %103 = vadd.xlane.f32.xlu0 %v102_v18 }
 0x158   :  { %v101_v19 = vpop.xlane.xlu0 %100 }
 0x159   :  { %v106_v20 = vmul.f32 0.03125, %v101_v19 }
 0x15b   :  { %v108_v21 = vsub.f32 %v97_v11, %v106_v20 }
 0x15c   :  { %v104_v22 = vpop.xlane.xlu0 %103 }
 0x15d   :  { %v107_v23 = vmul.f32 0.03125, %v104_v22  ;;  %v110_v24 = vmul.f32 %v108_v21, %v108_v21 }
 0x15f   :  { %v109_v25 = vsub.f32 %v98_v17, %v107_v23  ;;  %v112_v26 = vsel %vm50_vm1, %v110_v24, 0.0 }
 0x160   :  { %113 = vadd.xlane.f32.xlu1 %v112_v26 }
 0x161   :  { %v111_v27 = vmul.f32 %v109_v25, %v109_v25 }
 0x163   :  { %v115_v28 = vsel %vm50_vm1, %v111_v27, 0.0 }
 0x164   :  { %116 = vadd.xlane.f32.xlu1 %v115_v28 }
 0x1e9   :  { %v114_v29 = vpop.xlane.xlu1 %113 }
 0x1ea   :  { %v118_v30 = vmul.f32 0.03125, %v114_v29 }
 0x1ec   :  { %v120_v31 = vadd.f32 1e-05, %v118_v30 }
 0x1ed   :  { %v117_v32 = vpop.xlane.xlu1 %116 }
 0x1ee   :  { %171 = vrsqrt.f32 %v120_v31  ;;  %v119_v33 = vmul.f32 0.03125, %v117_v32 }
 0x1f0   :  { %v121_v34 = vadd.f32 1e-05, %v119_v33 }
 0x1f2   :  { %173 = vrsqrt.f32 %v121_v34 }
 0x1fb   :  { %v172_v35 = vpop.eup %171 }
 0x1fc   :  { %v124_v37 = vmul.f32 %v172_v35, %v108_v21 }
 0x1fe   :  { %v133_v39 = vmul.f32 %v154_v36, %v124_v37 }
 0x1ff   :  { %v174_v40 = vpop.eup %173 }
 0x200   :  { %v142_v41 = vadd.f32 %v155_v38, %v133_v39  ;;  %v125_v42 = vmul.f32 %v174_v40, %v109_v25 }
 0x202   :  { %144 = vst.msk [vmem:[%s258_s6] sm:$0xff] %vm50_vm1, %v142_v41  ;;  %v134_v43 = vmul.f32 %v154_v36, %v125_v42 }
 0x204   :  { %v143_v44 = vadd.f32 %v155_v38, %v134_v43 }
 0x206   :  { %145 = vst.msk [vmem:[%s258_s6 + $0x8] sm:$0xff] %vm50_vm1, %v143_v44 }

// kernel: decoder_forward.20
= control target key start
LH: loop header
LB: loop body
LE: loop exit
PB: predicated region body
PF: predicated region fallthrough
CT: control target
= control target key end

     0   :  { %vm19_vm0 = vcmask 523264   ;;  %v132_v0 = vmov 0.0   ;;  %vm133_vm1 = vmmov 0   ;;  %vm43_vm2 = vcmask 261120   ;;  %s181_s1 = inlined_call_operand.vmem [shape: bf16[32,64], index: 1, kind: input, shape index: {}]   ;;  %s182_s0 = inlined_call_operand.vmem [shape: f32[16,32], index: 0, kind: input, shape index: {}]   ;;  %s183_s2 = inlined_call_operand.vmem [shape: f32[1,64], index: 2, kind: input, shape index: {}]   ;;  %s184_s3 = inlined_call_operand.vmem [shape: f32[16,64], index: 3, kind: output, shape index: {}]  }
   0x1   :  { %120 = vmatprep.subr.bf16.mxu0 %v132_v0  ;;  %v130_v1 = vld [vmem:[%s181_s1 + $0x8] sm:$0xff]   ;;  %124 = vmatprep.mubr.msk.bf16.mxu0 %vm133_vm1, %v132_v0  ;;  %20 = vst.msk [vmem:[#allocation2] sm:$0xff] %vm19_vm0, %v132_v0  ;;  %21 = vst.msk [vmem:[#allocation2 + $0x8] sm:$0xff] %vm19_vm0, %v132_v0  ;;  %v131_v2 = vld [vmem:[%s181_s1] sm:$0xff]  }
   0x2   :  { %121 = vmatpush3.bf16.msra.mxu0 %v130_v1  ;;  %v24_v3 = vld [vmem:[%s182_s0] sm:$0xff]  ;;  %v25_v4 = vld [vmem:[%s182_s0 + $0x8] sm:$0xff] }
   0x3   :  { %122 = vmatprep.subr.bf16.mxu0 %v132_v0  ;;  %v26_v5 = vpack.c.bf16 %v25_v4, %v24_v3  ;;  %v116_v14 = vld [vmem:[%s183_s2] ss:$0 sm:$0xff] }
   0x6   :  { %123 = vmatpush3.bf16.msra.mxu0 %v131_v2 }
   0x8   :  { %v22_v6 = vld [vmem:[#allocation2] sm:$0xff]  ;;  %v23_v10 = vld [vmem:[#allocation2 + $0x8] sm:$0xff] }
   0x9   :  { %125 = vmatmul.mubr.msk.bf16.vlgmr.msra.gmra.mxu0 %vm43_vm2, %v26_v5 }
  0xc9   :  { %v81_v7 = vpop.f32.mrf.mxu0 }
  0xca   :  { %v88_v8 = vadd.f32 %v81_v7, %v22_v6 }
  0xcb   :  { %v126_v9 = vpop.f32.mrf.mxu0 }
  0xcc   :  { %91 = vst.msk [vmem:[#allocation2] sm:$0xff] %vm19_vm0, %v88_v8 }
  0xcd   :  { %v84_v11 = vpop.f32.mrf.mxu0 }
  0xce   :  { %v89_v12 = vadd.f32 %v84_v11, %v23_v10 }
  0xcf   :  { %v127_v13 = vpop.f32.mrf.mxu0 }
  0xd0   :  { %92 = vst.msk [vmem:[#allocation2 + $0x8] sm:$0xff] %vm19_vm0, %v89_v12 }
  0xd3   :  { %v96_v15 = vld [vmem:[#allocation2] sm:$0xff] }
  0xd4   :  { %v105_v16 = vadd.f32 %v116_v14, %v96_v15 }
  0xd6   :  { %107 = vst.msk [vmem:[%s184_s3] sm:$0xff] %vm19_vm0, %v105_v16 }
  0xd7   :  { %v97_v17 = vld [vmem:[#allocation2 + $0x8] sm:$0xff] }
  0xd8   :  { %v106_v18 = vadd.f32 %v116_v14, %v97_v17 }
  0xda   :  { %108 = vst.msk [vmem:[%s184_s3 + $0x8] sm:$0xff] %vm19_vm0, %v106_v18 }

// kernel: decoder_forward.21
= control target key start
LH: loop header
LB: loop body
LE: loop exit
PB: predicated region body
PF: predicated region fallthrough
CT: control target
= control target key end

     0   :  { %s842_s9 = smov 0   ;;  %s934_s0 = inlined_call_operand.vmem [shape: f32[16,32], index: 0, kind: input, shape index: {}]   ;;  %s935_s1 = inlined_call_operand.vmem [shape: f32[16,64], index: 1, kind: input, shape index: {}]   ;;  %s936_s2 = inlined_call_operand.vmem [shape: f32[16,32], index: 2, kind: output, shape index: {}]  }
   0x1 LB: > { %s689_s10 = sadd.s32 4294967295, %s813_s9   ;;  %p693_p0 = scmp.ge.s32.totalorder %s813_s9, 1  ;;  %s813_s9 = sphi %s842_s9, %s12_s9  }
   0x2   : > { %p120_p1 = scmp.lt.s32.totalorder %s813_s9, 3 }
   0x4   : > { %p121_p2 = pnand %p693_p0, %p120_p1 }
   0x5   : > { %p144_p3 = scmp.lt.s32.totalorder (!%p121_p2), %s689_s10, 1  ;;  %s817_s18 = smov (!%p121_p2), 120  }
   0x6   : > { %124 = sbr.rel (%p121_p2) target bundleno = 1069 (0x42d), region = 28  ;;  %s818_s19 = smov (!%p121_p2), 112  }
   0x7   : > { %s819_s20 = smov (!%p121_p2), 104   ;;  %s820_s21 = smov (!%p121_p2), 96  }
   0x8   : > { %s821_s22 = smov (!%p121_p2), 88   ;;  %s822_s23 = smov (!%p121_p2), 72  }
   0x9   : > { %s823_s24 = smov (!%p121_p2), 80   ;;  %s824_s25 = smov (!%p121_p2), 8  }
   0xa   : > { %s825_s26 = smov (!%p121_p2), 16   ;;  %s826_s27 = smov (!%p121_p2), 24  }
   0xb   : > { %v815_v0 = vmov 0.0   ;;  %vm816_vm0 = vmmov 0   ;;  %s938_s10 = smov (!%p144_p3, %s689_s10), 1  ;;  %vm161_vm1 = vcmask 64512   ;;  %vm225_vm2 = vcmask 1043456  }
   0xc   : > { %723 = vmatprep.subr.bf16.mxu0 %v815_v0  ;;  %725 = vmatprep.mubr.msk.bf16.mxu0 %vm816_vm0, %v815_v0  ;;  %s856_s11 = sshll.u32 %s938_s10, 3  ;;  %vm618_vm3 = vcmask 130048   ;;  %vm620_vm4 = vcmask 195584   ;;  %vm622_vm5 = vcmask 261120  }
   0xd   : > { %729 = vmatprep.subr.bf16.mxu1 %v815_v0  ;;  %731 = vmatprep.mubr.msk.bf16.mxu1 %vm816_vm0, %v815_v0  ;;  %s151_s14 = scalar_lea.vmem %s935_s1, %s856_s11  ;;  %s147_s17 = scalar_lea.vmem %s934_s0, %s856_s11 }
   0xe   : > { %v158_v1 = vld [vmem:[%s151_s14] sm:$0xff]  ;;  %s155_s30 = scalar_lea.vmem %s936_s2, %s856_s11 }
   0xf   : > { %v862_v2 = vpack.c.bf16 %v158_v1, %v158_v1  ;;  %v157_v4 = vld [vmem:[%s147_s17] sm:$0xff] }
  0x10   : > { %v159_v5 = vpack.c.bf16 %v157_v4, %v157_v4 }
  0x11   : > { %v166_v3 = vsel %vm161_vm1, %v862_v2, 0  ;;  %274 = vrot.lane.b32.xlu1 %v862_v2, %s817_s18 }
  0x12   : > { %724 = vmatpush3.bf16.xpose.msra.mxu0 %v166_v3 }
  0x13   : > { %741 = vmatprep.subr.bf16.mxu0 %v815_v0 }
  0x15   : > { %272 = vrot.lane.b32.xlu1 %v159_v5, %s817_s18 }
  0x19   : > { %726 = vmatmul.mubr.msk.bf16.vlgmr.msra.gmra.mxu0 %vm161_vm1, %v159_v5  ;;  %385 = vrot.lane.b32.xlu1 %v862_v2, %s818_s19 }
  0x1a   : > { %743 = vmatprep.mubr.msk.bf16.mxu0 %vm816_vm0, %v815_v0 }
  0x1d   : > { %383 = vrot.lane.b32.xlu1 %v159_v5, %s818_s19 }
  0x21   : > { %496 = vrot.lane.b32.xlu1 %v862_v2, %s819_s20 }
  0x25   : > { %494 = vrot.lane.b32.xlu1 %v159_v5, %s819_s20 }
  0x83   : > { %v275_v17 = vpop.permute.xlu1 %274 }
  0x84   : > { %v280_v20 = vsel %vm161_vm1, %v275_v17, 0 }
  0x87   : > { %v273_v18 = vpop.permute.xlu1 %272 }
  0x8b   : > { %v386_v22 = vpop.permute.xlu1 %385 }
  0x8c   : > { %v391_v24 = vsel %vm161_vm1, %v386_v22, 0 }
  0x8f   : > { %v384_v23 = vpop.permute.xlu1 %383 }
  0x93   : > { %v497_v25 = vpop.permute.xlu1 %496 }
  0x94   : > { %v502_v26 = vsel %vm161_vm1, %v497_v25, 0 }
  0x97   : > { %v495_v27 = vpop.permute.xlu1 %494 }
  0xd9   : > { %v202_v6 = vpop.f32.mrf.mxu0 }
  0xda   : > { %v208_v7 = vmul.f32 0.35355338, %v202_v6 }
  0xdb   : > { %v727_v8 = vpop.f32.mrf.mxu0 }
  0xdc   : > { %v209_v9 = vsel %vm161_vm1, %v208_v7, -inf }
  0xdd   : > { %210 = vmax.xlane.f32.xlu0 %v209_v9  ;;  %v205_v10 = vpop.f32.mrf.mxu0 }
  0xdf   : > { %v728_v11 = vpop.f32.mrf.mxu0 }
  0xf3   : > { %220 = vrot.lane.b32.xlu0 %v862_v2, %s820_s21 }
 0x166   : > { %v211_v12 = vpop.xlane.xlu0 %210 }
 0x167   : > { %v212_v13 = vsub.f32 %v208_v7, %v211_v12 }
 0x169   : > { %v213_v14 = vmul.f32 1.442695, %v212_v13 }
 0x16a   : > { %v221_v15 = vpop.permute.xlu0 %220 }
 0x16b   : > { %791 = vpow2.f32 %v213_v14  ;;  %v227_v16 = vsel %vm225_vm2, %v221_v15, 0 }
 0x16c   : > { %730 = vmatpush3.bf16.msra.mxu1 %v227_v16 }
 0x16d   : > { %735 = vmatprep.subr.bf16.mxu1 %v815_v0 }
 0x178   : > { %v881_v19 = vpop.eup %791 }
 0x179   : > { %v218_v21 = vpack.c.bf16 %v881_v19, %v881_v19  ;;  %v215_v3 = vsel %vm161_vm1, %v881_v19, 0.0 }
 0x17b   : > { %732 = vmatmul.mubr.msk.bf16.vlgmr.msra.gmra.mxu1 %vm161_vm1, %v218_v21 }
 0x17c   : > { %736 = vmatpush3.bf16.xpose.msra.mxu1 %v280_v20  ;;  %737 = vmatprep.mubr.msk.bf16.mxu1 %vm816_vm0, %v815_v0 }
 0x17d   : > { %747 = vmatprep.subr.bf16.mxu1 %v815_v0 }
 0x183   : > { %738 = vmatmul.mubr.msk.bf16.vlgmr.msra.gmra.mxu1 %vm161_vm1, %v273_v18 }
 0x184   : > { %748 = vmatpush3.bf16.xpose.msra.mxu1 %v391_v24  ;;  %749 = vmatprep.mubr.msk.bf16.mxu1 %vm816_vm0, %v815_v0 }
 0x185   : > { %759 = vmatprep.subr.bf16.mxu1 %v815_v0 }
 0x18b   : > { %750 = vmatmul.mubr.msk.bf16.vlgmr.msra.gmra.mxu1 %vm161_vm1, %v384_v23 }
 0x18c   : > { %760 = vmatpush3.bf16.xpose.msra.mxu1 %v502_v26  ;;  %761 = vmatprep.mubr.msk.bf16.mxu1 %vm816_vm0, %v815_v0 }
 0x193   : > { %762 = vmatmul.mubr.msk.bf16.vlgmr.msra.gmra.mxu1 %vm161_vm1, %v495_v27 }
 0x23b   : > { %v900_v28 = vpop.f32.mrf.mxu1 }
 0x23d   : > { %v733_v29 = vpop.f32.mrf.mxu1 }
 0x23f   : > { %v266_v30 = vpop.f32.mrf.mxu1 }
 0x241   : > { %v734_v31 = vpop.f32.mrf.mxu1 }
 0x243   : > { %v316_v32 = vpop.f32.mrf.mxu1 }
 0x244   : > { %v322_v33 = vmul.f32 0.35355338, %v316_v32 }
 0x245   : > { %v739_v34 = vpop.f32.mrf.mxu1 }
 0x246   : > { %v323_v35 = vsel %vm161_vm1, %v322_v33, -inf }
 0x247   : > { %324 = vmax.xlane.f32.xlu1 %v323_v35  ;;  %v319_v36 = vpop.f32.mrf.mxu1 }
 0x249   : > { %v740_v37 = vpop.f32.mrf.mxu1 }
 0x24b   : > { %v427_v38 = vpop.f32.mrf.mxu1 }
 0x24c   : > { %v433_v39 = vmul.f32 0.35355338, %v427_v38 }
 0x24d   : > { %v751_v40 = vpop.f32.mrf.mxu1 }
 0x24e   : > { %v434_v41 = vsel %vm161_vm1, %v433_v39, -inf }
 0x24f   : > { %435 = vmax.xlane.f32.xlu0 %v434_v41  ;;  %v430_v42 = vpop.f32.mrf.mxu1 }
 0x251   : > { %v752_v43 = vpop.f32.mrf.mxu1 }
 0x253   : > { %v538_v44 = vpop.f32.mrf.mxu1 }
 0x254   : > { %v544_v45 = vmul.f32 0.35355338, %v538_v44 }
 0x255   : > { %v763_v46 = vpop.f32.mrf.mxu1 }
 0x256   : > { %v545_v47 = vsel %vm161_vm1, %v544_v45, -inf }
 0x257   : > { %546 = vmax.xlane.f32.xlu0 %v545_v47  ;;  %v541_v48 = vpop.f32.mrf.mxu1 }
 0x258   : > { %333 = vrot.lane.b32.xlu1 %v862_v2, %s821_s22 }
 0x259   : > { %v764_v49 = vpop.f32.mrf.mxu1 }
 0x25c   : > { %555 = vrot.lane.b32.xlu1 %v862_v2, %s822_s23 }
 0x26d   : > { %444 = vrot.lane.b32.xlu0 %v862_v2, %s823_s24 }
 0x2d0   : > { %v325_v50 = vpop.xlane.xlu1 %324 }
 0x2d1   : > { %v326_v51 = vsub.f32 %v322_v33, %v325_v50 }
 0x2d3   : > { %v327_v52 = vmul.f32 1.442695, %v326_v51 }
 0x2d4   : > { %v334_v53 = vpop.permute.xlu1 %333 }
 0x2d5   : > { %793 = vpow2.f32 %v327_v52  ;;  %v339_v54 = vsel %vm225_vm2, %v334_v53, 0 }
 0x2d6   : > { %742 = vmatpush3.bf16.msra.mxu0 %v339_v54 }
 0x2d7   : > { %753 = vmatprep.subr.bf16.mxu0 %v815_v0 }
 0x2d8   : > { %v436_v55 = vpop.xlane.xlu0 %435  ;;  %v556_v4 = vpop.permute.xlu1 %555 }
 0x2d9   : > { %v437_v56 = vsub.f32 %v433_v39, %v436_v55  ;;  %v561_v6 = vsel %vm225_vm2, %v556_v4, 0 }
 0x2db   : > { %v438_v57 = vmul.f32 1.442695, %v437_v56 }
 0x2dd   : > { %795 = vpow2.f32 %v438_v57 }
 0x2e0   : > { %v547_v58 = vpop.xlane.xlu0 %546 }
 0x2e1   : > { %v548_v59 = vsub.f32 %v544_v45, %v547_v58 }
 0x2e2   : > { %v794_v60 = vpop.eup %793 }
 0x2e3   : > { %v549_v61 = vmul.f32 1.442695, %v548_v59  ;;  %v329_v62 = vsel %vm161_vm1, %v794_v60, 0.0  ;;  %v332_v63 = vpack.c.bf16 %v794_v60, %v794_v60 }
 0x2e4   : > { %330 = vadd.xlane.f32.xlu1 %v329_v62  ;;  %v445_v1 = vpop.permute.xlu0 %444 }
 0x2e5   : > { %797 = vpow2.f32 %v549_v61  ;;  %v450_v2 = vsel %vm225_vm2, %v445_v1, 0  ;;  %744 = vmatmul.mubr.msk.bf16.vlgmr.msra.gmra.mxu0 %vm161_vm1, %v332_v63 }
 0x2e6   : > { %754 = vmatpush3.bf16.msra.mxu0 %v450_v2  ;;  %755 = vmatprep.mubr.msk.bf16.mxu0 %vm816_vm0, %v815_v0 }
 0x2e7   : > { %765 = vmatprep.subr.bf16.mxu0 %v815_v0 }
 0x2e8   : > { %216 = vadd.xlane.f32.xlu1 %v215_v3 }
 0x2ea   : > { %v796_v5 = vpop.eup %795 }
 0x2eb   : > { %v440_v7 = vsel %vm161_vm1, %v796_v5, 0.0  ;;  %v443_v8 = vpack.c.bf16 %v796_v5, %v796_v5 }
 0x2ec   : > { %441 = vadd.xlane.f32.xlu0 %v440_v7 }
 0x2ed   : > { %756 = vmatmul.mubr.msk.bf16.vlgmr.msra.gmra.mxu0 %vm161_vm1, %v443_v8 }
 0x2ee   : > { %766 = vmatpush3.bf16.msra.mxu0 %v561_v6  ;;  %767 = vmatprep.mubr.msk.bf16.mxu0 %vm816_vm0, %v815_v0 }
 0x2f2   : > { %v798_v9 = vpop.eup %797 }
 0x2f3   : > { %v551_v10 = vsel %vm161_vm1, %v798_v9, 0.0  ;;  %v554_v11 = vpack.c.bf16 %v798_v9, %v798_v9 }
 0x2f4   : > { %552 = vadd.xlane.f32.xlu0 %v551_v10 }
 0x2f5   : > { %768 = vmatmul.mubr.msk.bf16.vlgmr.msra.gmra.mxu0 %vm161_vm1, %v554_v11 }
 0x36d   : > { %v331_v12 = vpop.xlane.xlu1 %330 }
 0x36e   : > { %799 = vrcp.f32 %v331_v12 }
 0x371   : > { %v217_v33 = vpop.xlane.xlu1 %216 }
 0x375   : > { %v442_v13 = vpop.xlane.xlu0 %441 }
 0x376   : > { %801 = vrcp.f32 %v442_v13 }
 0x37b   : > { %v800_v14 = vpop.eup %799 }
 0x37d   : > { %v553_v15 = vpop.xlane.xlu0 %552 }
 0x37e   : > { %803 = vrcp.f32 %v553_v15 }
 0x37f   : > { %805 = vrcp.f32 %v217_v33 }
 0x383   : > { %v802_v20 = vpop.eup %801 }
 0x38b   : > { %v804_v26 = vpop.eup %803 }
 0x38c   : > { %v806_v34 = vpop.eup %805 }
 0x38d   : > { %v270_v37 = vmul.f32 %v806_v34, %v900_v28 }
 0x3a5   : > { %v375_v16 = vpop.f32.mrf.mxu0 }
 0x3a6   : > { %v382_v17 = vmul.f32 %v800_v14, %v375_v16 }
 0x3a7   : > { %v745_v18 = vpop.f32.mrf.mxu0 }
 0x3a8   : > { %606 = vrot.lane.b32.xlu0 %v382_v17, %s824_s25 }
 0x3a9   : > { %v378_v0 = vpop.f32.mrf.mxu0 }
 0x3ab   : > { %v746_v19 = vpop.f32.mrf.mxu0 }
 0x3ad   : > { %v486_v21 = vpop.f32.mrf.mxu0 }
 0x3ae   : > { %v493_v22 = vmul.f32 %v802_v20, %v486_v21 }
 0x3af   : > { %v757_v23 = vpop.f32.mrf.mxu0 }
 0x3b0   : > { %610 = vrot.lane.b32.xlu1 %v493_v22, %s825_s26 }
 0x3b1   : > { %v489_v24 = vpop.f32.mrf.mxu0 }
 0x3b3   : > { %v758_v25 = vpop.f32.mrf.mxu0 }
 0x3b5   : > { %v597_v27 = vpop.f32.mrf.mxu0 }
 0x3b6   : > { %v604_v29 = vmul.f32 %v804_v26, %v597_v27 }
 0x3b7   : > { %v769_v30 = vpop.f32.mrf.mxu0 }
 0x3b8   : > { %614 = vrot.lane.b32.xlu1 %v604_v29, %s826_s27 }
 0x3b9   : > { %v600_v31 = vpop.f32.mrf.mxu0 }
 0x3bb   : > { %v770_v32 = vpop.f32.mrf.mxu0 }
 0x41a   : > { %v607_v35 = vpop.permute.xlu0 %606 }
 0x41b   : > { %v617_v38 = vsel %vm161_vm1, %v270_v37, %v607_v35 }
 0x422   : > { %v611_v36 = vpop.permute.xlu1 %610 }
 0x423   : > { %v619_v39 = vsel %vm618_vm3, %v617_v38, %v611_v36 }
 0x42a   : > { %v615_v40 = vpop.permute.xlu1 %614 }
 0x42b   : > { %v621_v41 = vsel %vm620_vm4, %v619_v39, %v615_v40 }
 0x42c   : > { %623 = vst.msk [vmem:[%s155_s30] sm:$0xff] %vm622_vm5, %v621_v41 }
 0x42d PF: > { %s12_s9 = sadd.s32 1, %s813_s9  }
 0x42e   : > { %p9_p4 = scmp.ge.s32.totalorder %s12_s9, 4  }
 0x430   :  { %11 = sbr.rel (!%p9_p4) target bundleno = 1 (0x1), region = 61 }

// kernel: decoder_forward.31
= control target key start
LH: loop header
LB: loop body
LE: loop exit
PB: predicated region body
PF: predicated region fallthrough
CT: control target
= control target key end

     0   :  { %v328_v1 = vmov 0.0   ;;  %vm329_vm0 = vmmov 0   ;;  %vm54_vm1 = vcmask 261120   ;;  %s419_s0 = inlined_call_operand.vmem [shape: f32[16,32], index: 0, kind: input, shape index: {}]   ;;  %s420_s1 = inlined_call_operand.vmem [shape: bf16[32,64], index: 1, kind: input, shape index: {}]   ;;  %s421_s2 = inlined_call_operand.vmem [shape: f32[1,64], index: 2, kind: input, shape index: {}]   ;;  %s422_s3 = inlined_call_operand.vmem [shape: bf16[64,32], index: 3, kind: input, shape index: {}]   ;;  %s423_s4 = inlined_call_operand.vmem [shape: f32[1,32], index: 4, kind: input, shape index: {}]   ;;  %s424_s5 = inlined_call_operand.vmem [shape: f32[1,32], index: 5, kind: input, shape index: {}]   ;;  %s425_s6 = inlined_call_operand.vmem [shape: f32[1,32], index: 6, kind: input, shape index: {}]   ;;  %s426_s7 = inlined_call_operand.hbm [shape: f32[16,32], index: 7, kind: output, shape index: {}]  }
   0x1   :  { %v296_v0 = vld [vmem:[%s420_s1 + $0x8] sm:$0xff]   ;;  %271 = vmatprep.subr.bf16.mxu0 %v328_v1  ;;  %v297_v2 = vld [vmem:[%s420_s1] sm:$0xff]   ;;  %279 = vmatprep.subr.bf16.mxu1 %v328_v1  ;;  %v298_v5 = vld [vmem:[%s422_s3 + $0x18] sm:$0xff]  }
   0x2   :  { %272 = vmatpush3.bf16.msra.mxu0 %v296_v0  ;;  %275 = vmatprep.mubr.msk.bf16.mxu0 %vm329_vm0, %v328_v1  ;;  %v28_v3 = vld [vmem:[%s419_s0] sm:$0xff]  ;;  %v29_v4 = vld [vmem:[%s419_s0 + $0x8] sm:$0xff] }
   0x3   :  { %273 = vmatprep.subr.bf16.mxu0 %v328_v1  ;;  %287 = vmatprep.mubr.msk.bf16.mxu1 %vm329_vm0, %v328_v1  ;;  %v30_v6 = vpack.c.bf16 %v29_v4, %v28_v3 }
   0x4   :  { %280 = vmatpush3.bf16.msra.mxu1 %v298_v5 }
   0x5   :  { %281 = vmatprep.subr.bf16.mxu1 %v328_v1 }
   0x6   :  { %274 = vmatpush3.bf16.msra.mxu0 %v297_v2 }
   0x7   :  { %12 = vsyncpa [#allocation3], 0  ;;  %v299_v7 = vld [vmem:[%s422_s3 + $0x10] sm:$0xff]   ;;  %v300_v8 = vld [vmem:[%s422_s3 + $0x8] sm:$0xff]   ;;  %vm141_vm2 = vcmask 523264   ;;  %s330_s20 = smov [#allocation2]  }
   0x8   :  { %282 = vmatpush3.bf16.msra.mxu1 %v299_v7  ;;  %v301_v9 = vld [vmem:[%s422_s3] sm:$0xff]   ;;  %s240_s21 = sshll.u32 %s330_s20, 4  ;;  %s241_s21 = int_to_ptr.vmem [resolvable:$true] %s240_s21 }
   0x9   :  { %276 = vmatmul.mubr.msk.bf16.vlgmr.msra.gmra.mxu0 %vm54_vm1, %v30_v6  ;;  %283 = vmatprep.subr.bf16.mxu1 %v328_v1  ;;  %v251_v10 = vld [vmem:[%s421_s2] ss:$0 sm:$0xff]  ;;  %s306_s22 = scalar_lea.vmem %s241_s21, 256  ;;  %p311_p1 = scmp.lt.s32.totalorder %s241_s21, %s241_s21 }
   0xa   :  { %v255_v20 = vld [vmem:[%s423_s4] ss:$0 sm:$0xff]  ;;  %p307_p0 = scmp.ne.s32.totalorder %s241_s21, %s306_s22  ;;  %p312_p2 = scmp.lt.s32.totalorder %s306_s22, %s306_s22 }
   0xb   :  { %v261_v48 = vld [vmem:[%s424_s5] ss:$0 sm:$0xff] }
   0xc   :  { %284 = vmatpush3.bf16.msra.mxu1 %v300_v8  ;;  %v262_v50 = vld [vmem:[%s425_s6] ss:$0 sm:$0xff]  ;;  %p313_p3 = por %p312_p2, %p311_p1 }
   0xd   :  { %285 = vmatprep.subr.bf16.mxu1 %v328_v1 }
   0xe   :  { %p314_p4 = pnand %p313_p3, %p307_p0 }
  0x10   :  { %286 = vmatpush3.bf16.msra.mxu1 %v301_v9 }
  0xc9   :  { %v92_v11 = vpop.f32.mrf.mxu0 }
  0xca   :  { %v93_v13 = vadd.f32 %v251_v10, %v92_v11 }
  0xcb   :  { %v277_v12 = vpop.f32.mrf.mxu0 }
  0xcc   :  { %v99_v17 = vmax.f32 %v93_v13, 0.0 }
  0xcd   :  { %v95_v14 = vpop.f32.mrf.mxu0 }
  0xce   :  { %v96_v15 = vadd.f32 %v251_v10, %v95_v14 }
  0xcf   :  { %v278_v16 = vpop.f32.mrf.mxu0 }
  0xd0   :  { %v100_v18 = vmax.f32 %v96_v15, 0.0 }
  0xd2   :  { %v101_v19 = vpack.c.bf16 %v100_v18, %v99_v17 }
  0xd4   :  { %288 = vmatmul.mubr.msk.bf16.vlgmr.msra.gmra.mxu1 %vm141_vm2, %v101_v19 }
 0x194   :  { %v179_v21 = vpop.f32.mrf.mxu1 }
 0x195   :  { %v180_v22 = vadd.f32 %v255_v20, %v179_v21 }
 0x196   :  { %v289_v23 = vpop.f32.mrf.mxu1 }
 0x197   :  { %v186_v24 = vadd.f32 %v180_v22, %v28_v3 }
 0x198   :  { %v182_v25 = vpop.f32.mrf.mxu1 }
 0x199   :  { %v183_v26 = vadd.f32 %v255_v20, %v182_v25  ;;  %v188_v27 = vsel %vm54_vm1, %v186_v24, 0.0 }
 0x19a   :  { %189 = vadd.xlane.f32.xlu0 %v188_v27  ;;  %v290_v28 = vpop.f32.mrf.mxu1 }
 0x19b   :  { %v187_v29 = vadd.f32 %v183_v26, %v29_v4 }
 0x19d   :  { %v191_v30 = vsel %vm54_vm1, %v187_v29, 0.0 }
 0x19e   :  { %192 = vadd.xlane.f32.xlu0 %v191_v30 }
 0x223   :  { %v190_v31 = vpop.xlane.xlu0 %189 }
 0x224   :  { %v195_v32 = vmul.f32 0.03125, %v190_v31 }
 0x226   :  { %v197_v33 = vsub.f32 %v186_v24, %v195_v32 }
 0x227   :  { %v193_v34 = vpop.xlane.xlu0 %192 }
 0x228   :  { %v196_v35 = vmul.f32 0.03125, %v193_v34  ;;  %v199_v36 = vmul.f32 %v197_v33, %v197_v33 }
 0x22a   :  { %v198_v37 = vsub.f32 %v187_v29, %v196_v35  ;;  %v201_v38 = vsel %vm54_vm1, %v199_v36, 0.0 }
 0x22b   :  { %202 = vadd.xlane.f32.xlu1 %v201_v38 }
 0x22c   :  { %v200_v39 = vmul.f32 %v198_v37, %v198_v37 }
 0x22e   :  { %v204_v40 = vsel %vm54_vm1, %v200_v39, 0.0 }
 0x22f   :  { %205 = vadd.xlane.f32.xlu1 %v204_v40 }
 0x2b4   :  { %v203_v41 = vpop.xlane.xlu1 %202 }
 0x2b5   :  { %v207_v42 = vmul.f32 0.03125, %v203_v41 }
 0x2b7   :  { %v209_v43 = vadd.f32 1e-05, %v207_v42 }
 0x2b8   :  { %v206_v44 = vpop.xlane.xlu1 %205 }
 0x2b9   :  { %302 = vrsqrt.f32 %v209_v43  ;;  %v208_v45 = vmul.f32 0.03125, %v206_v44 }
 0x2bb   :  { %v210_v46 = vadd.f32 1e-05, %v208_v45 }
 0x2bd   :  { %304 = vrsqrt.f32 %v210_v46 }
 0x2c6   :  { %v303_v47 = vpop.eup %302 }
 0x2c7   :  { %v213_v49 = vmul.f32 %v303_v47, %v197_v33 }
 0x2c9   :  { %v222_v51 = vmul.f32 %v261_v48, %v213_v49 }
 0x2ca   :  { %v305_v52 = vpop.eup %304 }
 0x2cb   :  { %v214_v53 = vmul.f32 %v305_v52, %v198_v37  ;;  %v231_v54 = vadd.f32 %v262_v50, %v222_v51 }
 0x2cd   :  { %v223_v55 = vmul.f32 %v261_v48, %v214_v53  ;;  %233 = vst.msk [vmem:[#allocation2] sm:$0xff] %vm54_vm1, %v231_v54 }
 0x2cf   :  { %v232_v56 = vadd.f32 %v262_v50, %v223_v55 }
 0x2d1   :  { %234 = vst.msk [vmem:[#allocation2 + $0x8] sm:$0xff] %vm54_vm1, %v232_v56 }
 0x2d2   :  { %317 = shalt.err (!%p314_p4)
}
 0x2d3   :  { %s331_s5 = smov 128   ;;  %s332_s6 = smov 8  }
 0x2d4   :  { %246 = dma.vmem_to_hbm [thread:$0]  %s241_s21, 256, %s426_s7, [#allocation3], %s331_s5, %s331_s5, %s332_s6  }
 0x2d5   :  { %326 = dma.done.wait [#allocation3], 256  }
 0x2d6   :  { %327 = vsyncadd [#allocation3], 4294967040 }
 0x2d7   :  { %250 = vsyncpa [#allocation3], 1 }

// kernel: decoder_forward.23
= control target key start
LH: loop header
LB: loop body
LE: loop exit
PB: predicated region body
PF: predicated region fallthrough
CT: control target
= control target key end

     0   :  { %v290_v0 = vmov 0.0   ;;  %vm291_vm0 = vmmov 0   ;;  %vm53_vm1 = vcmask 261120   ;;  %vm140_vm2 = vcmask 523264   ;;  %s381_s1 = inlined_call_operand.vmem [shape: bf16[32,64], index: 1, kind: input, shape index: {}]   ;;  %s382_s0 = inlined_call_operand.vmem [shape: f32[16,32], index: 0, kind: input, shape index: {}]   ;;  %s383_s3 = inlined_call_operand.vmem [shape: bf16[64,32], index: 3, kind: input, shape index: {}]   ;;  %s384_s2 = inlined_call_operand.vmem [shape: f32[1,64], index: 2, kind: input, shape index: {}]   ;;  %s385_s4 = inlined_call_operand.vmem [shape: f32[1,32], index: 4, kind: input, shape index: {}]   ;;  %s386_s5 = inlined_call_operand.vmem [shape: f32[1,32], index: 5, kind: input, shape index: {}]   ;;  %s387_s6 = inlined_call_operand.vmem [shape: f32[1,32], index: 6, kind: input, shape index: {}]   ;;  %s388_s7 = inlined_call_operand.vmem [shape: f32[16,32], index: 7, kind: output, shape index: {}]  }
   0x1   :  { %258 = vmatprep.subr.bf16.mxu0 %v290_v0  ;;  %v280_v1 = vld [vmem:[%s381_s1 + $0x8] sm:$0xff]   ;;  %262 = vmatprep.mubr.msk.bf16.mxu0 %vm291_vm0, %v290_v0  ;;  %v281_v2 = vld [vmem:[%s381_s1] sm:$0xff]   ;;  %v282_v5 = vld [vmem:[%s383_s3 + $0x18] sm:$0xff]  }
   0x2   :  { %266 = vmatprep.subr.bf16.mxu1 %v290_v0  ;;  %274 = vmatprep.mubr.msk.bf16.mxu1 %vm291_vm0, %v290_v0  ;;  %v27_v3 = vld [vmem:[%s382_s0] sm:$0xff]  ;;  %v28_v4 = vld [vmem:[%s382_s0 + $0x8] sm:$0xff]  ;;  %v283_v7 = vld [vmem:[%s383_s3 + $0x10] sm:$0xff]  }
   0x3   :  { %259 = vmatpush3.bf16.msra.mxu0 %v280_v1  ;;  %v29_v6 = vpack.c.bf16 %v28_v4, %v27_v3  ;;  %267 = vmatpush3.bf16.msra.mxu1 %v282_v5  ;;  %v284_v8 = vld [vmem:[%s383_s3 + $0x8] sm:$0xff]   ;;  %v285_v9 = vld [vmem:[%s383_s3] sm:$0xff]  }
   0x4   :  { %260 = vmatprep.subr.bf16.mxu0 %v290_v0  ;;  %268 = vmatprep.subr.bf16.mxu1 %v290_v0  ;;  %v238_v10 = vld [vmem:[%s384_s2] ss:$0 sm:$0xff] }
   0x5   :  { %v242_v20 = vld [vmem:[%s385_s4] ss:$0 sm:$0xff] }
   0x6   :  { %v248_v48 = vld [vmem:[%s386_s5] ss:$0 sm:$0xff] }
   0x7   :  { %261 = vmatpush3.bf16.msra.mxu0 %v281_v2  ;;  %269 = vmatpush3.bf16.msra.mxu1 %v283_v7  ;;  %v249_v50 = vld [vmem:[%s387_s6] ss:$0 sm:$0xff] }
   0x8   :  { %270 = vmatprep.subr.bf16.mxu1 %v290_v0 }
   0xa   :  { %263 = vmatmul.mubr.msk.bf16.vlgmr.msra.gmra.mxu0 %vm53_vm1, %v29_v6 }
   0xb   :  { %271 = vmatpush3.bf16.msra.mxu1 %v284_v8 }
   0xc   :  { %272 = vmatprep.subr.bf16.mxu1 %v290_v0 }
   0xf   :  { %273 = vmatpush3.bf16.msra.mxu1 %v285_v9 }
  0xca   :  { %v91_v11 = vpop.f32.mrf.mxu0 }
  0xcb   :  { %v92_v13 = vadd.f32 %v238_v10, %v91_v11 }
  0xcc   :  { %v264_v12 = vpop.f32.mrf.mxu0 }
  0xcd   :  { %v98_v17 = vmax.f32 %v92_v13, 0.0 }
  0xce   :  { %v94_v14 = vpop.f32.mrf.mxu0 }
  0xcf   :  { %v95_v15 = vadd.f32 %v238_v10, %v94_v14 }
  0xd0   :  { %v265_v16 = vpop.f32.mrf.mxu0 }
  0xd1   :  { %v99_v18 = vmax.f32 %v95_v15, 0.0 }
  0xd3   :  { %v100_v19 = vpack.c.bf16 %v99_v18, %v98_v17 }
  0xd5   :  { %275 = vmatmul.mubr.msk.bf16.vlgmr.msra.gmra.mxu1 %vm140_vm2, %v100_v19 }
 0x195   :  { %v178_v21 = vpop.f32.mrf.mxu1 }
 0x196   :  { %v179_v22 = vadd.f32 %v242_v20, %v178_v21 }
 0x197   :  { %v276_v23 = vpop.f32.mrf.mxu1 }
 0x198   :  { %v185_v24 = vadd.f32 %v179_v22, %v27_v3 }
 0x199   :  { %v181_v25 = vpop.f32.mrf.mxu1 }
 0x19a   :  { %v182_v26 = vadd.f32 %v242_v20, %v181_v25  ;;  %v187_v27 = vsel %vm53_vm1, %v185_v24, 0.0 }
 0x19b   :  { %188 = vadd.xlane.f32.xlu0 %v187_v27  ;;  %v277_v28 = vpop.f32.mrf.mxu1 }
 0x19c   :  { %v186_v29 = vadd.f32 %v182_v26, %v28_v4 }
 0x19e   :  { %v190_v30 = vsel %vm53_vm1, %v186_v29, 0.0 }
 0x19f   :  { %191 = vadd.xlane.f32.xlu0 %v190_v30 }
 0x224   :  { %v189_v31 = vpop.xlane.xlu0 %188 }
 0x225   :  { %v194_v32 = vmul.f32 0.03125, %v189_v31 }
 0x227   :  { %v196_v33 = vsub.f32 %v185_v24, %v194_v32 }
 0x228   :  { %v192_v34 = vpop.xlane.xlu0 %191 }
 0x229   :  { %v195_v35 = vmul.f32 0.03125, %v192_v34  ;;  %v198_v36 = vmul.f32 %v196_v33, %v196_v33 }
 0x22b   :  { %v197_v37 = vsub.f32 %v186_v29, %v195_v35  ;;  %v200_v38 = vsel %vm53_vm1, %v198_v36, 0.0 }
 0x22c   :  { %201 = vadd.xlane.f32.xlu1 %v200_v38 }
 0x22d   :  { %v199_v39 = vmul.f32 %v197_v37, %v197_v37 }
 0x22f   :  { %v203_v40 = vsel %vm53_vm1, %v199_v39, 0.0 }
 0x230   :  { %204 = vadd.xlane.f32.xlu1 %v203_v40 }
 0x2b5   :  { %v202_v41 = vpop.xlane.xlu1 %201 }
 0x2b6   :  { %v206_v42 = vmul.f32 0.03125, %v202_v41 }
 0x2b8   :  { %v208_v43 = vadd.f32 1e-05, %v206_v42 }
 0x2b9   :  { %v205_v44 = vpop.xlane.xlu1 %204 }
 0x2ba   :  { %286 = vrsqrt.f32 %v208_v43  ;;  %v207_v45 = vmul.f32 0.03125, %v205_v44 }
 0x2bc   :  { %v209_v46 = vadd.f32 1e-05, %v207_v45 }
 0x2be   :  { %288 = vrsqrt.f32 %v209_v46 }
 0x2c7   :  { %v287_v47 = vpop.eup %286 }
 0x2c8   :  { %v212_v49 = vmul.f32 %v287_v47, %v196_v33 }
 0x2ca   :  { %v221_v51 = vmul.f32 %v248_v48, %v212_v49 }
 0x2cb   :  { %v289_v52 = vpop.eup %288 }
 0x2cc   :  { %v230_v53 = vadd.f32 %v249_v50, %v221_v51  ;;  %v213_v54 = vmul.f32 %v289_v52, %v197_v37 }
 0x2ce   :  { %232 = vst.msk [vmem:[%s388_s7] sm:$0xff] %vm53_vm1, %v230_v53  ;;  %v222_v55 = vmul.f32 %v248_v48, %v213_v54 }
 0x2d0   :  { %v231_v56 = vadd.f32 %v249_v50, %v222_v55 }
 0x2d2   :  { %233 = vst.msk [vmem:[%s388_s7 + $0x8] sm:$0xff] %vm53_vm1, %v231_v56 }

</bundles_post_ra>
